<compile_context>
chip_gen: v6e
topology: v6e:2x2x1
jax: 0.10.0
libtpu: 0.0.40
codegen_flags: <defaults>
</compile_context>

<pallas_src>
import functools

import numpy as np
import jax
import jax.numpy as jnp
from jax.experimental import pallas as pl
from jax.experimental.pallas import tpu as pltpu

N_VIEWS = 36          # panorama views
KNOW_PER_VIEW = 100   # knowledge_vector reshaped to (..., 36, 100)
DETECT_EXTRA = 300    # linear_key in_dim = ctx_dim + knowledge_dim + 300


def get_pano_affinity():
    """NumPy port of get_pano_affinity (cv2-free)."""
    pano_a = np.eye(36, dtype=float)
    for view_id in range(0, 12):
        pano_a[view_id, view_id + 12] = 1
        if view_id == 0:
            pano_a[view_id, 11] = 1
            pano_a[view_id, 11 + 12] = 1
        else:
            pano_a[view_id, view_id - 1] = 1
            pano_a[view_id, view_id - 1 + 12] = 1
        if view_id == 11:
            pano_a[view_id, 0] = 1
            pano_a[view_id, 0 + 12] = 1
        else:
            pano_a[view_id, view_id + 1] = 1
            pano_a[view_id, view_id + 1 + 12] = 1
    for view_id in range(12, 24):
        pano_a[view_id, view_id + 12] = 1
        pano_a[view_id, view_id - 12] = 1
        if view_id == 12:
            pano_a[view_id, 23] = 1
            pano_a[view_id, 23 + 12] = 1
            pano_a[view_id, 23 - 12] = 1
        else:
            pano_a[view_id, view_id - 1] = 1
            pano_a[view_id, view_id - 1 + 12] = 1
            pano_a[view_id, view_id - 1 - 12] = 1
        if view_id == 23:
            pano_a[view_id, 12] = 1
            pano_a[view_id, 12 + 12] = 1
            pano_a[view_id, 12 - 12] = 1
        else:
            pano_a[view_id, view_id + 1] = 1
            pano_a[view_id, view_id + 1 + 12] = 1
            pano_a[view_id, view_id + 1 - 12] = 1
    for view_id in range(24, 36):
        pano_a[view_id, view_id - 12] = 1
        if view_id == 24:
            pano_a[view_id, 35] = 1
            pano_a[view_id, 35 - 12] = 1
        else:
            pano_a[view_id, view_id - 1] = 1
            pano_a[view_id, view_id - 1 - 12] = 1
        if view_id == 35:
            pano_a[view_id, 24] = 1
            pano_a[view_id, 24 - 12] = 1
        else:
            pano_a[view_id, view_id + 1] = 1
            pano_a[view_id, view_id + 1 - 12] = 1
    assert np.sum(pano_a - pano_a.T) == 0
    # cv.GaussianBlur(x, (3,3), 0): ksize=3 & sigma<=0 -> fixed separable kernel
    # [0.25, 0.5, 0.25]; border handled with a reflect pad (consistent kernel/reference).
    k = np.array([0.25, 0.5, 0.25], dtype=float)
    padded = np.pad(pano_a, 1, mode="reflect")
    tmp = padded[:, :-2] * k[0] + padded[:, 1:-1] * k[1] + padded[:, 2:] * k[2]
    pano_a = tmp[:-2, :] * k[0] + tmp[1:-1, :] * k[1] + tmp[2:, :] * k[2]
    pano_a[np.eye(36, dtype=int) == 1] = 1
    return pano_a


def _pano_attn_kernel(scale, sb, compute_dtype,
                      qpT_ref, v_ref, d_ref, kns_ref,
                      pano_ref, wkv_ref, wkd_ref, woc_ref, woks_ref,
                      h_ref, p_ref):
    f32 = jnp.float32
    rows = sb * N_VIEWS

    qpT = qpT_ref[0]      # (dq, sb)      pre-projected queries, transposed
    V = v_ref[...]        # (sb*36, dc)   flattened panorama features
    Dt = d_ref[...]       # (sb*36, dd)   flattened detect features
    Kns = kns_ref[...]    # (sb*36, 101)  knowledge | structural

    # ---- energy path (K never materialized):  e[r, s] = V[r]·(Wk_v^T q_s) + Dt[r]·(Wk_d^T q_s)
    at = jnp.dot(wkv_ref[...], qpT, preferred_element_type=f32)     # (dc, sb)
    bt = jnp.dot(wkd_ref[...], qpT, preferred_element_type=f32)     # (dd, sb)
    e = (jnp.dot(V, at.astype(compute_dtype), preferred_element_type=f32) +
         jnp.dot(Dt, bt.astype(compute_dtype), preferred_element_type=f32)) * scale  # (rows, sb)

    # Flattened row r belongs to sample r // 36; keep only its own sample's column.
    r_id = jax.lax.broadcasted_iota(jnp.int32, (rows, sb), 0)
    s_id = jax.lax.broadcasted_iota(jnp.int32, (rows, sb), 1)
    lo = s_id * N_VIEWS
    own = jnp.logical_and(r_id >= lo, r_id < lo + N_VIEWS)

    # TODO(synk): mask / masked_fill(-inf) path not implemented (forward called with mask=None).
    e_m = jnp.where(own, e, -1e30)
    m = jnp.max(e_m, axis=0, keepdims=True)            # (1, sb)   per-sample max
    p_all = jnp.exp(e_m - m)                           # 0 outside the own-sample block
    z = jnp.sum(p_all, axis=0, keepdims=True)          # (1, sb)   per-sample denom
    p_all = p_all / z
    p_col = jnp.sum(p_all, axis=1, keepdims=True)      # (rows, 1) softmax prob per flattened row
    p_ref[...] = p_col.astype(p_ref.dtype)

    # ---- output path: blockdiag(pano) @ (p ⊙ (V @ Wo_c^T)) + [knowledge|structural] @ Wo_ks^T
    c = jnp.dot(V, woc_ref[...], preferred_element_type=f32)         # (rows, dq)  big MXU matmul
    cp = (p_col * c).astype(compute_dtype)
    hc = jnp.dot(pano_ref[...], cp, preferred_element_type=f32)      # (rows, dq)
    hk = jnp.dot(Kns, woks_ref[...], preferred_element_type=f32)     # (rows, dq)
    h_ref[...] = jnp.tanh(hc + hk).astype(h_ref.dtype)


def pano_attention_v2(Q, V, detect_feats, knowledge_vector, structural_embeds,
                      teacher_action_view_ids, params, *, query_dim, ctx_dim,
                      knowledge_dim, mask=None, output_tilde=True, output_prob=True,
                      samples_per_step=8, compute_dtype=jnp.bfloat16):
    del teacher_action_view_ids  # reshaped but never used in the torch forward
    assert mask is None                    # TODO(synk): mask path not implemented
    assert output_tilde and output_prob    # TODO(synk): logit / context-only outputs not implemented

    B, L = Q.shape[0], Q.shape[1]
    ba = B * L
    dq, dc = query_dim, ctx_dim
    dd = knowledge_dim + DETECT_EXTRA
    k1 = KNOW_PER_VIEW + 1

    Wq, Wk, Wo, pano = params["Wq"], params["Wk"], params["Wo"], params["pano"]

    # Samples per grid step: the (sb*36, .) block needs its sublane dim to be a multiple of 8
    # unless it covers the whole array, so force sb even whenever sb < ba.
    sb = int(max(1, min(samples_per_step, ba)))
    if sb < ba and sb % 2 == 1:
        sb += 1
    sb = min(sb, ba)
    nb = -(-ba // sb)
    ba_pad = nb * sb
    pad = ba_pad - ba
    rows = sb * N_VIEWS

    # Hoisted linear_query (single XLA GEMM), then laid out as (nb, dq, sb) so the kernel
    # reads q^T directly (no in-kernel transpose, block = full trailing dims).
    Qp = jnp.dot(Q.reshape(ba, dq).astype(jnp.float32), Wq.T.astype(jnp.float32))
    if pad:
        Qp = jnp.concatenate([Qp, jnp.zeros((pad, dq), Qp.dtype)], axis=0)
    QpT = jnp.swapaxes(Qp.reshape(nb, sb, dq), 1, 2).astype(compute_dtype)

    def flat(x, feat):
        x = x.reshape(ba, N_VIEWS, feat).astype(jnp.float32)
        if pad:
            x = jnp.concatenate([x, jnp.zeros((pad, N_VIEWS, feat), x.dtype)], axis=0)
        return x.reshape(ba_pad * N_VIEWS, feat).astype(compute_dtype)

    Vf = flat(V, dc)
    Df = flat(detect_feats, dd)
    # structural_embeds folded into the knowledge slab (avoids a 1-lane per-step DMA).
    Knf = flat(jnp.concatenate(
        [knowledge_vector.reshape(ba, N_VIEWS, KNOW_PER_VIEW).astype(jnp.float32),
         structural_embeds.reshape(ba, N_VIEWS, 1).astype(jnp.float32)], axis=-1), k1)

    # Block-diagonal pano affinity: applies the per-sample 36x36 mix as one batched matmul.
    pano_bd = jnp.kron(jnp.eye(sb, dtype=jnp.float32),
                       pano.astype(jnp.float32)).astype(compute_dtype)

    wkv = Wk[:, :dc].T.astype(compute_dtype)     # (dc, dq)   linear_key, V half
    wkd = Wk[:, dc:].T.astype(compute_dtype)     # (dd, dq)   linear_key, detect half
    woc = Wo[:, :dc].T.astype(compute_dtype)     # (dc, dq)   linear_out, context half
    woks = Wo[:, dc:].T.astype(compute_dtype)    # (101, dq)  linear_out, knowledge+structural

    scale = float(query_dim) ** (-0.5)
    kernel = functools.partial(_pano_attn_kernel, scale, sb, compute_dtype)

    def shared2(shape):
        return pl.BlockSpec(shape, lambda b: (0, 0))

    h_flat, p_flat = pl.pallas_call(
        kernel,
        grid=(nb,),
        in_specs=[
            pl.BlockSpec((1, dq, sb), lambda b: (b, 0, 0)),     # Qp^T
            pl.BlockSpec((rows, dc), lambda b: (b, 0)),         # V (views flattened into rows)
            pl.BlockSpec((rows, dd), lambda b: (b, 0)),         # detect_feats
            pl.BlockSpec((rows, k1), lambda b: (b, 0)),         # knowledge | structural
            shared2((rows, rows)),                              # blockdiag(pano)
            shared2((dc, dq)),                                  # Wk[:, :dc]^T
            shared2((dd, dq)),                                  # Wk[:, dc:]^T
            shared2((dc, dq)),                                  # Wo[:, :dc]^T
            shared2((k1, dq)),                                  # Wo[:, dc:]^T
        ],
        out_specs=(
            pl.BlockSpec((rows, dq), lambda b: (b, 0)),         # h_tilde (lane-dense)
            pl.BlockSpec((rows, 1), lambda b: (b, 0)),          # softmax probabilities
        ),
        out_shape=(
            jax.ShapeDtypeStruct((ba_pad * N_VIEWS, dq), jnp.float32),
            jax.ShapeDtypeStruct((ba_pad * N_VIEWS, 1), jnp.float32),
        ),
        compiler_params=pltpu.CompilerParams(
            dimension_semantics=("parallel",),
            vmem_limit_bytes=64 * 1024 * 1024),
    )(QpT, Vf, Df, Knf, pano_bd, wkv, wkd, woc, woks)

    n = ba * N_VIEWS
    h_tilde = h_flat[:n].reshape(ba, N_VIEWS, dq)
    energy = p_flat[:n, 0].reshape(ba, 1, N_VIEWS)   # (ba, 1, 36), same as the torch module
    return h_tilde, energy


def reference_forward(Q, V, detect_feats, knowledge_vector, structural_embeds,
                      params, *, query_dim, ctx_dim):
    """Pure-JAX reference mirroring the torch forward (mask=None, output_prob/tilde=True)."""
    ba = Q.shape[0] * Q.shape[1]
    dq, dc = query_dim, ctx_dim
    Wq, Wk, Wo, pano = params["Wq"], params["Wk"], params["Wo"], params["pano"]
    Qf = Q.reshape(ba, dq) @ Wq.T
    Vf = V.reshape(ba, N_VIEWS, dc)
    Kcat = jnp.concatenate([Vf, detect_feats.reshape(ba, N_VIEWS, -1)], axis=2)
    K = (Kcat.reshape(-1, Kcat.shape[-1]) @ Wk.T).reshape(ba, N_VIEWS, dq)
    energy = jnp.einsum("bnd,bd->bn", K, Qf) * (dq ** -0.5)
    p = jax.nn.softmax(energy, axis=1)
    attn = p[:, None, :] * pano[None]
    wctx = jnp.einsum("bij,bjd->bid", attn, Vf)
    h_in = jnp.concatenate(
        [wctx,
         knowledge_vector.reshape(ba, N_VIEWS, KNOW_PER_VIEW),
         structural_embeds.reshape(ba, N_VIEWS, 1)], axis=2)
    h = jnp.tanh(h_in @ Wo.T)
    return h, p[:, None, :]


if __name__ == "__main__":
    B, L = 2, 4
    query_dim, ctx_dim, knowledge_dim = 32, 64, 16
    dd = knowledge_dim + DETECT_EXTRA

    key = jax.random.PRNGKey(0)
    ks = jax.random.split(key, 9)
    Q = jax.random.normal(ks[0], (B, L, query_dim), jnp.float32)
    V = jax.random.normal(ks[1], (B, L, N_VIEWS, ctx_dim), jnp.float32)
    detect_feats = jax.random.normal(ks[2], (B, L, N_VIEWS, dd), jnp.float32)
    knowledge_vector = jax.random.normal(ks[3], (B, L, N_VIEWS, KNOW_PER_VIEW), jnp.float32)
    structural_embeds = jax.random.normal(ks[4], (B, L, N_VIEWS), jnp.float32)
    teacher_action_view_ids = jnp.zeros((B, L), jnp.int32)  # unused by forward

    # Deterministic parameter init (nn.Linear weight shapes, bias=False).
    def init_w(k, out_d, in_d):
        bound = 1.0 / np.sqrt(in_d)
        return jax.random.uniform(k, (out_d, in_d), jnp.float32, -bound, bound)

    Wq = init_w(ks[5], query_dim, query_dim)                           # linear_query
    Wk = init_w(ks[6], query_dim, ctx_dim + knowledge_dim + 300)       # linear_key
    Wo = init_w(ks[7], query_dim, ctx_dim + KNOW_PER_VIEW + 1)         # linear_out (2277 orig.)

    pano = np.asarray(get_pano_affinity(), dtype=np.float32)
    pano[pano == 0] = 0.01                                             # pano_a[pano_a.eq(0)] = 0.01
    pano = jnp.asarray(pano)
    params = {"Wq": Wq, "Wk": Wk, "Wo": Wo, "pano": pano}

    def run_and_check(Bc, Lc, cdtype, sb, rtol, atol):
        args = (Q[:Bc, :Lc], V[:Bc, :Lc], detect_feats[:Bc, :Lc],
                knowledge_vector[:Bc, :Lc], structural_embeds[:Bc, :Lc])
        h, e = pano_attention_v2(*args, teacher_action_view_ids[:Bc, :Lc], params,
                                 query_dim=query_dim, ctx_dim=ctx_dim,
                                 knowledge_dim=knowledge_dim,
                                 samples_per_step=sb, compute_dtype=cdtype)
        jax.block_until_ready((h, e))
        h_ref, e_ref = reference_forward(*args, params,
                                         query_dim=query_dim, ctx_dim=ctx_dim)
        np.testing.assert_allclose(np.asarray(h), np.asarray(h_ref), rtol=rtol, atol=atol)
        np.testing.assert_allclose(np.asarray(e), np.asarray(e_ref), rtol=rtol, atol=atol)

    # f32 compute path: tight check, multi-step grid (ba=8, sb=4 -> 2 grid steps).
    run_and_check(2, 4, jnp.float32, 4, 1e-3, 1e-3)
    # f32 compute path, ragged batch (ba=6 padded to 8): exercises the padding path.
    run_and_check(2, 3, jnp.float32, 4, 1e-3, 1e-3)
    # bf16 matmul inputs (default fast path), f32 accumulation: loose check vs f32 reference.
    run_and_check(2, 4, jnp.bfloat16, 4, 1e-1, 5e-2)

    print("KERNEL_OK")
</pallas_src>

<mosaic_0001>
module attributes {stable_mosaic.version = 11 : i64} {
  func.func @_pano_attn_kernel(%arg0: i32, %arg1: memref<1x32x4xf32, #tpu.memory_space<vmem>>, %arg2: memref<144x64xf32, #tpu.memory_space<vmem>>, %arg3: memref<144x316xf32, #tpu.memory_space<vmem>>, %arg4: memref<144x101xf32, #tpu.memory_space<vmem>>, %arg5: memref<144x144xf32, #tpu.memory_space<vmem>>, %arg6: memref<64x32xf32, #tpu.memory_space<vmem>>, %arg7: memref<316x32xf32, #tpu.memory_space<vmem>>, %arg8: memref<64x32xf32, #tpu.memory_space<vmem>>, %arg9: memref<101x32xf32, #tpu.memory_space<vmem>>, %arg10: memref<144x32xf32, #tpu.memory_space<vmem>>, %arg11: memref<144x1xf32, #tpu.memory_space<vmem>>) attributes {dimension_semantics = [#tpu.dimension_semantics<parallel>], iteration_bounds = array<i64: 2>, scalar_prefetch = 0 : i64, scratch_operands = 0 : i64, tpu.core_type = #tpu.core_type<tc>, window_params = [{transform_indices = @transform_0, window_bounds = array<i64: 1, 32, 4>}, {transform_indices = @transform_1, window_bounds = array<i64: 144, 64>}, {transform_indices = @transform_2, window_bounds = array<i64: 144, 316>}, {transform_indices = @transform_3, window_bounds = array<i64: 144, 101>}, {pipeline_mode = #tpu.pipeline_mode<synchronous>, transform_indices = @transform_4, window_bounds = array<i64: 144, 144>}, {pipeline_mode = #tpu.pipeline_mode<synchronous>, transform_indices = @transform_5, window_bounds = array<i64: 64, 32>}, {pipeline_mode = #tpu.pipeline_mode<synchronous>, transform_indices = @transform_6, window_bounds = array<i64: 316, 32>}, {pipeline_mode = #tpu.pipeline_mode<synchronous>, transform_indices = @transform_7, window_bounds = array<i64: 64, 32>}, {pipeline_mode = #tpu.pipeline_mode<synchronous>, transform_indices = @transform_8, window_bounds = array<i64: 101, 32>}, {transform_indices = @transform_9, window_bounds = array<i64: 144, 32>}, {transform_indices = @transform_10, window_bounds = array<i64: 144, 1>}]} {
    %c0 = arith.constant 0 : index
    %c0_0 = arith.constant 0 : index
    %c0_1 = arith.constant 0 : index
    %0 = vector.load %arg1[%c0, %c0_0, %c0_1] : memref<1x32x4xf32, #tpu.memory_space<vmem>>, vector<1x32x4xf32>
    %1 = vector.shape_cast %0 : vector<1x32x4xf32> to vector<32x4xf32>
    %c0_2 = arith.constant 0 : index
    %c0_3 = arith.constant 0 : index
    %2 = vector.load %arg2[%c0_2, %c0_3] : memref<144x64xf32, #tpu.memory_space<vmem>>, vector<144x64xf32>
    %c0_4 = arith.constant 0 : index
    %c0_5 = arith.constant 0 : index
    %3 = vector.load %arg3[%c0_4, %c0_5] : memref<144x316xf32, #tpu.memory_space<vmem>>, vector<144x316xf32>
    %c0_6 = arith.constant 0 : index
    %c0_7 = arith.constant 0 : index
    %4 = vector.load %arg4[%c0_6, %c0_7] : memref<144x101xf32, #tpu.memory_space<vmem>>, vector<144x101xf32>
    %c0_8 = arith.constant 0 : index
    %c0_9 = arith.constant 0 : index
    %5 = vector.load %arg6[%c0_8, %c0_9] : memref<64x32xf32, #tpu.memory_space<vmem>>, vector<64x32xf32>
    %cst = arith.constant dense<0.000000e+00> : vector<64x4xf32>
    %6 = tpu.matmul %5, %1, %cst {dimension_numbers = #tpu.dot_dimension_numbers<[1], [0], [0], [1], [0, 0, 1, 1], [], []>} : vector<64x32xf32>, vector<32x4xf32>, vector<64x4xf32> -> vector<64x4xf32>
    %c0_10 = arith.constant 0 : index
    %c0_11 = arith.constant 0 : index
    %7 = vector.load %arg7[%c0_10, %c0_11] : memref<316x32xf32, #tpu.memory_space<vmem>>, vector<316x32xf32>
    %cst_12 = arith.constant dense<0.000000e+00> : vector<316x4xf32>
    %8 = tpu.matmul %7, %1, %cst_12 {dimension_numbers = #tpu.dot_dimension_numbers<[1], [0], [0], [1], [0, 0, 1, 1], [], []>} : vector<316x32xf32>, vector<32x4xf32>, vector<316x4xf32> -> vector<316x4xf32>
    %cst_13 = arith.constant dense<0.000000e+00> : vector<144x4xf32>
    %9 = tpu.matmul %2, %6, %cst_13 {dimension_numbers = #tpu.dot_dimension_numbers<[1], [0], [0], [1], [0, 0, 1, 1], [], []>} : vector<144x64xf32>, vector<64x4xf32>, vector<144x4xf32> -> vector<144x4xf32>
    %cst_14 = arith.constant dense<0.000000e+00> : vector<144x4xf32>
    %10 = tpu.matmul %3, %8, %cst_14 {dimension_numbers = #tpu.dot_dimension_numbers<[1], [0], [0], [1], [0, 0, 1, 1], [], []>} : vector<144x316xf32>, vector<316x4xf32>, vector<144x4xf32> -> vector<144x4xf32>
    %11 = arith.addf %9, %10 : vector<144x4xf32>
    %cst_15 = arith.constant 0.176776692 : f32
    %12 = vector.broadcast %cst_15 : f32 to vector<144x4xf32>
    %13 = arith.mulf %11, %12 : vector<144x4xf32>
    %14 = tpu.iota {dimensions = array<i32: 0>} : vector<144x4xi32>
    %15 = tpu.iota {dimensions = array<i32: 1>} : vector<144x4xi32>
    %c36_i32 = arith.constant 36 : i32
    %16 = vector.broadcast %c36_i32 : i32 to vector<144x4xi32>
    %17 = arith.muli %15, %16 : vector<144x4xi32>
    %18 = arith.cmpi sge, %14, %17 : vector<144x4xi32>
    %c36_i32_16 = arith.constant 36 : i32
    %19 = vector.broadcast %c36_i32_16 : i32 to vector<144x4xi32>
    %20 = arith.addi %17, %19 : vector<144x4xi32>
    %21 = arith.cmpi slt, %14, %20 : vector<144x4xi32>
    %22 = arith.andi %18, %21 : vector<144x4xi1>
    %cst_17 = arith.constant -1.000000e+30 : f32
    %23 = vector.broadcast %cst_17 : f32 to vector<144x4xf32>
    %24 = arith.select %22, %13, %23 : vector<144x4xi1>, vector<144x4xf32>
    %cst_18 = arith.constant dense<0xFF800000> : vector<4xf32>
    %25 = vector.multi_reduction <maximumf>, %24, %cst_18 [0] : vector<144x4xf32> to vector<4xf32>
    %26 = vector.shape_cast %25 : vector<4xf32> to vector<1x4xf32>
    %27 = vector.broadcast %26 : vector<1x4xf32> to vector<144x4xf32>
    %28 = arith.subf %24, %27 : vector<144x4xf32>
    %29 = math.exp %28 : vector<144x4xf32>
    %cst_19 = arith.constant dense<0.000000e+00> : vector<4xf32>
    %30 = vector.multi_reduction <add>, %29, %cst_19 [0] : vector<144x4xf32> to vector<4xf32>
    %31 = vector.shape_cast %30 : vector<4xf32> to vector<1x4xf32>
    %32 = vector.broadcast %31 : vector<1x4xf32> to vector<144x4xf32>
    %33 = arith.divf %29, %32 : vector<144x4xf32>
    %cst_20 = arith.constant dense<0.000000e+00> : vector<144xf32>
    %34 = vector.multi_reduction <add>, %33, %cst_20 [1] : vector<144x4xf32> to vector<144xf32>
    %35 = vector.shape_cast %34 : vector<144xf32> to vector<144x1xf32>
    %c0_21 = arith.constant 0 : index
    %c0_22 = arith.constant 0 : index
    %36 = vector.load %arg11[%c0_21, %c0_22] : memref<144x1xf32, #tpu.memory_space<vmem>>, vector<144x1xf32>
    tpu.vector_store %arg11[%c0_21, %c0_22], %35 {strides = array<i32>} : memref<144x1xf32, #tpu.memory_space<vmem>>, vector<144x1xf32>,
    %c0_23 = arith.constant 0 : index
    %c0_24 = arith.constant 0 : index
    %37 = vector.load %arg8[%c0_23, %c0_24] : memref<64x32xf32, #tpu.memory_space<vmem>>, vector<64x32xf32>
    %cst_25 = arith.constant dense<0.000000e+00> : vector<144x32xf32>
    %38 = tpu.matmul %2, %37, %cst_25 {dimension_numbers = #tpu.dot_dimension_numbers<[1], [0], [0], [1], [0, 0, 1, 1], [], []>} : vector<144x64xf32>, vector<64x32xf32>, vector<144x32xf32> -> vector<144x32xf32>
    %39 = vector.broadcast %35 : vector<144x1xf32> to vector<144x32xf32>
    %40 = arith.mulf %39, %38 : vector<144x32xf32>
    %c0_26 = arith.constant 0 : index
    %c0_27 = arith.constant 0 : index
    %41 = vector.load %arg5[%c0_26, %c0_27] : memref<144x144xf32, #tpu.memory_space<vmem>>, vector<144x144xf32>
    %cst_28 = arith.constant dense<0.000000e+00> : vector<144x32xf32>
    %42 = tpu.matmul %41, %40, %cst_28 {dimension_numbers = #tpu.dot_dimension_numbers<[1], [0], [0], [1], [0, 0, 1, 1], [], []>} : vector<144x144xf32>, vector<144x32xf32>, vector<144x32xf32> -> vector<144x32xf32>
    %c0_29 = arith.constant 0 : index
    %c0_30 = arith.constant 0 : index
    %43 = vector.load %arg9[%c0_29, %c0_30] : memref<101x32xf32, #tpu.memory_space<vmem>>, vector<101x32xf32>
    %cst_31 = arith.constant dense<0.000000e+00> : vector<144x32xf32>
    %44 = tpu.matmul %4, %43, %cst_31 {dimension_numbers = #tpu.dot_dimension_numbers<[1], [0], [0], [1], [0, 0, 1, 1], [], []>} : vector<144x101xf32>, vector<101x32xf32>, vector<144x32xf32> -> vector<144x32xf32>
    %45 = arith.addf %42, %44 : vector<144x32xf32>
    %46 = math.tanh %45 : vector<144x32xf32>
    %c0_32 = arith.constant 0 : index
    %c0_33 = arith.constant 0 : index
    %47 = vector.load %arg10[%c0_32, %c0_33] : memref<144x32xf32, #tpu.memory_space<vmem>>, vector<144x32xf32>
    tpu.vector_store %arg10[%c0_32, %c0_33], %46 {strides = array<i32>} : memref<144x32xf32, #tpu.memory_space<vmem>>, vector<144x32xf32>,
    return
  }
  func.func @transform_0(%arg0: i32) -> (i32, i32, i32) {
    %c0_i32 = arith.constant 0 : i32
    %c0_i32_0 = arith.constant 0 : i32
    %c0_i32_1 = arith.constant 0 : i32
    return %arg0, %c0_i32, %c0_i32_0 : i32, i32, i32
  }
  func.func @transform_1(%arg0: i32) -> (i32, i32) {
    %c0_i32 = arith.constant 0 : i32
    %c0_i32_0 = arith.constant 0 : i32
    return %arg0, %c0_i32 : i32, i32
  }
  func.func @transform_2(%arg0: i32) -> (i32, i32) {
    %c0_i32 = arith.constant 0 : i32
    %c0_i32_0 = arith.constant 0 : i32
    return %arg0, %c0_i32 : i32, i32
  }
  func.func @transform_3(%arg0: i32) -> (i32, i32) {
    %c0_i32 = arith.constant 0 : i32
    %c0_i32_0 = arith.constant 0 : i32
    return %arg0, %c0_i32 : i32, i32
  }
  func.func @transform_4(%arg0: i32) -> (i32, i32) {
    %c0_i32 = arith.constant 0 : i32
    %c0_i32_0 = arith.constant 0 : i32
    %c0_i32_1 = arith.constant 0 : i32
    return %c0_i32, %c0_i32_0 : i32, i32
  }
  func.func @transform_5(%arg0: i32) -> (i32, i32) {
    %c0_i32 = arith.constant 0 : i32
    %c0_i32_0 = arith.constant 0 : i32
    %c0_i32_1 = arith.constant 0 : i32
    return %c0_i32, %c0_i32_0 : i32, i32
  }
  func.func @transform_6(%arg0: i32) -> (i32, i32) {
    %c0_i32 = arith.constant 0 : i32
    %c0_i32_0 = arith.constant 0 : i32
    %c0_i32_1 = arith.constant 0 : i32
    return %c0_i32, %c0_i32_0 : i32, i32
  }
  func.func @transform_7(%arg0: i32) -> (i32, i32) {
    %c0_i32 = arith.constant 0 : i32
    %c0_i32_0 = arith.constant 0 : i32
    %c0_i32_1 = arith.constant 0 : i32
    return %c0_i32, %c0_i32_0 : i32, i32
  }
  func.func @transform_8(%arg0: i32) -> (i32, i32) {
    %c0_i32 = arith.constant 0 : i32
    %c0_i32_0 = arith.constant 0 : i32
    %c0_i32_1 = arith.constant 0 : i32
    return %c0_i32, %c0_i32_0 : i32, i32
  }
  func.func @transform_9(%arg0: i32) -> (i32, i32) {
    %c0_i32 = arith.constant 0 : i32
    %c0_i32_0 = arith.constant 0 : i32
    return %arg0, %c0_i32 : i32, i32
  }
  func.func @transform_10(%arg0: i32) -> (i32, i32) {
    %c0_i32 = arith.constant 0 : i32
    %c0_i32_0 = arith.constant 0 : i32
    return %arg0, %c0_i32 : i32, i32
  }
}

</mosaic_0001>

<bundles_post_ra>
// kernel: tpu_custom_call.1
= control target key start
LH: loop header
LB: loop body
LE: loop exit
PB: predicated region body
PF: predicated region fallthrough
CT: control target
= control target key end

     0   :  { %16 = vsyncpa [#allocation3], 0  ;;  %s3715_s13 = smov 0   ;;  %s5063_s0 = inlined_call_operand.vmem [shape: f32[2,32,4], index: 0, kind: input, shape index: {}]   ;;  %s5064_s1 = inlined_call_operand.vmem [shape: f32[288,64], index: 1, kind: input, shape index: {}]   ;;  %s5065_s2 = inlined_call_operand.vmem [shape: f32[288,316], index: 2, kind: input, shape index: {}]   ;;  %s5066_s3 = inlined_call_operand.vmem [shape: f32[288,101], index: 3, kind: input, shape index: {}]   ;;  %s5067_s4 = inlined_call_operand.hbm [shape: f32[144,144], index: 4, kind: input, shape index: {}]   ;;  %s5068_s5 = inlined_call_operand.vmem [shape: f32[64,32], index: 5, kind: input, shape index: {}]   ;;  %s5069_s6 = inlined_call_operand.vmem [shape: f32[316,32], index: 6, kind: input, shape index: {}]   ;;  %s5070_s7 = inlined_call_operand.vmem [shape: f32[64,32], index: 7, kind: input, shape index: {}]   ;;  %s5071_s8 = inlined_call_operand.vmem [shape: f32[101,32], index: 8, kind: input, shape index: {}]   ;;  %s5072_s9 = inlined_call_operand.vmem [shape: f32[288,32], index: 9, kind: output, shape index: {0}]   ;;  %s5073_s10 = inlined_call_operand.vmem [shape: f32[288,1], index: 10, kind: output, shape index: {1}]  }
   0x1 LB: > { %s3721_s14 = sadd.s32 4294967295, %s3654_s13   ;;  %p2867_p0 = scmp.ge.s32.totalorder %s3654_s13, 1  ;;  %s3654_s13 = sphi %s3715_s13, %s22_s13  }
   0x2   : > { %p288_p1 = scmp.lt.s32.totalorder %s3654_s13, 3  ;;  %s3656_s15 = smov [#allocation2]  }
   0x3   : > { %s300_s16 = sshll.u32 %s3656_s15, 4  ;;  %p3530_p3 = scmp.eq.s32.totalorder %s3721_s14, 0  ;;  %s301_s16 = int_to_ptr.vmem [resolvable:$true] %s300_s16 }
   0x4   : > { %p3725_p2 = pnand %p2867_p0, %p288_p1  ;;  %s3629_s18 = scalar_lea.vmem %s301_s16, 4608 }
   0x5   : > { %p3630_p7 = scmp.ne.s32.totalorder %s301_s16, %s3629_s18  ;;  %p3637_p10 = scmp.lt.s32.totalorder %s301_s16, %s301_s16 }
   0x6   : > { %p3526_p4 = pneg %p3725_p2  ;;  %p3638_p11 = scmp.lt.s32.totalorder %s3629_s18, %s3629_s18 }
   0x8   : > { %p3527_p5 = pnand %p3530_p3, %p3526_p4  ;;  %p3639_p12 = por %p3638_p11, %p3637_p10 }
   0xa   : > { %p3620_p6 = pneg %p3527_p5 }
   0xc   : > { %p3632_p8 = pnand %p3630_p7, %p3620_p6 }
   0xe   : > { %p3633_p9 = pneg %p3632_p8 }
  0x10   : > { %p3640_p13 = pnand %p3639_p12, %p3633_p9 }
  0x12   : > { %3643 = shalt.err (!%p3640_p13)
}
  0x13   : > { %s3657_s19 = smov 256   ;;  %s3658_s20 = smov 16  }
  0x14   : > { %3529 = dma.hbm_to_vmem [thread:$0]  (!%p3527_p5), %s5067_s4, 4608, %s301_s16, [#allocation3], %s3657_s19, %s3657_s19, %s3658_s20  }
  0x15   : > { %364 = sbr.rel (%p3725_p2) target bundleno = 1180 (0x49c), region = 56 }
  0x1a   : > { %3649 = dma.done.wait (%p3530_p3), [#allocation3], 4608  }
  0x1b   : > { %3651 = vsyncadd (%p3530_p3), [#allocation3], 4294962688  ;;  %p423_p0 = scmp.lt.s32.totalorder %s3721_s14, 1  ;;  %vm5074_vm0 = vcmask 261120   ;;  %v691_v2 = vld [vmem:[%s5069_s6] sm:$0xff]  ;;  %v692_v5 = vld [vmem:[%s5069_s6 + $0x8] sm:$0xff] }
  0x1c   : > { %3215 = vmatprep.mubr.msk.f32.mxu1 %vm5074_vm0, %v691_v2  ;;  %v693_v6 = vld [vmem:[%s5069_s6 + $0x10] sm:$0xff]  ;;  %v694_v7 = vld [vmem:[%s5069_s6 + $0x18] sm:$0xff]  ;;  %v695_v8 = vld [vmem:[%s5069_s6 + $0x20] sm:$0xff]  ;;  %v3659_v52 = vmov 0.0   ;;  %s428_s16 = smul.u32 18, %s3721_s14  ;;  %vm1171_vm1 = vcmask 1043456  }
  0x1d   : > { %s424_s23 = scalar_select %p423_p0, %s3721_s14, 1  ;;  %v696_v9 = vld [vmem:[%s5069_s6 + $0x28] sm:$0xff]  ;;  %v553_v10 = vld [vmem:[%s5068_s5] sm:$0xff]  ;;  %v697_v11 = vld [vmem:[%s5069_s6 + $0x30] sm:$0xff]  ;;  %vm1116_vm2 = vcmask 490496   ;;  %vm1485_vm3 = vcmask 523264  }
  0x1e   : > { %3195 = vmatprep.mubr.msk.f32.mxu0 %vm5074_vm0, %v553_v10  ;;  %v554_v12 = vld [vmem:[%s5068_s5 + $0x8] sm:$0xff]  ;;  %v555_v13 = vld [vmem:[%s5068_s5 + $0x10] sm:$0xff]  ;;  %v556_v14 = vld [vmem:[%s5068_s5 + $0x18] sm:$0xff]  ;;  %p429_p1 = scmp.lt.s32.totalorder %s428_s16, 35 }
  0x1f   : > { %s3021_s24 = sshll.u32 %s424_s23, 5  ;;  %v698_v15 = vld [vmem:[%s5069_s6 + $0x38] sm:$0xff]  ;;  %v557_v16 = vld [vmem:[%s5068_s5 + $0x20] sm:$0xff]  ;;  %v558_v18 = vld [vmem:[%s5068_s5 + $0x28] sm:$0xff] }
  0x20   : > { %s427_s27 = scalar_lea.vmem %s5063_s0, %s3021_s24  ;;  %v699_v17 = vld [vmem:[%s5069_s6 + $0x40] sm:$0xff]  ;;  %v700_v19 = vld [vmem:[%s5069_s6 + $0x48] sm:$0xff]  ;;  %v559_v20 = vld [vmem:[%s5068_s5 + $0x30] sm:$0xff]  ;;  %s5169_s16 = smov (!%p429_p1, %s428_s16), 35 }
  0x21   : > { %v462_v0 = vld [vmem:[%s427_s27 + $0x18] sm:$0xff]  ;;  %v461_v1 = vld [vmem:[%s427_s27 + $0x10] sm:$0xff]  ;;  %v460_v3 = vld [vmem:[%s427_s27 + $0x8] sm:$0xff]  ;;  %s3521_s17 = smul.u32 24, %s5169_s16  ;;  %s4147_s14 = sshll.u32 %s5169_s16, 3 }
  0x22   : > { %3207 = vmatprep.subr.mxu1 %v462_v0  ;;  %3187 = vmatprep.subr.mxu0 %v462_v0  ;;  %v459_v4 = vld [vmem:[%s427_s27] sm:$0xff]  ;;  %v701_v21 = vld [vmem:[%s5069_s6 + $0x50] sm:$0xff]  ;;  %v560_v22 = vld [vmem:[%s5068_s5 + $0x38] sm:$0xff]  ;;  %s4159_s23 = scalar_lea.vmem %s5064_s1, %s4147_s14  ;;  %s4870_s22 = scalar_lea.vmem %s5066_s3, %s4147_s14 }
  0x23   : > { %3208 = vmatpush3.msra.mxu1 %v462_v0  ;;  %3188 = vmatpush3.msra.mxu0 %v462_v0  ;;  %v702_v23 = vld [vmem:[%s5069_s6 + $0x58] sm:$0xff]  ;;  %v703_v24 = vld [vmem:[%s5069_s6 + $0x60] sm:$0xff]  ;;  %v704_v25 = vld [vmem:[%s5069_s6 + $0x68] sm:$0xff]  ;;  %s3949_s20 = scalar_lea.vmem %s5065_s2, %s3521_s17  ;;  %s4940_s17 = scalar_lea.vmem %s5073_s10, %s4147_s14 }
  0x24   : > { %3209 = vmatprep.subr.mxu1 %v461_v1  ;;  %3189 = vmatprep.subr.mxu0 %v461_v1  ;;  %v705_v26 = vld [vmem:[%s5069_s6 + $0x70] sm:$0xff]  ;;  %v706_v27 = vld [vmem:[%s5069_s6 + $0x78] sm:$0xff]  ;;  %v707_v28 = vld [vmem:[%s5069_s6 + $0x80] sm:$0xff] }
  0x25   : > { %3210 = vmatpush3.msra.mxu1 %v461_v1  ;;  %3190 = vmatpush3.msra.mxu0 %v461_v1  ;;  %v708_v29 = vld [vmem:[%s5069_s6 + $0x88] sm:$0xff]  ;;  %v709_v30 = vld [vmem:[%s5069_s6 + $0x90] sm:$0xff]  ;;  %v710_v31 = vld [vmem:[%s5069_s6 + $0x98] sm:$0xff] }
  0x26   : > { %3211 = vmatprep.subr.mxu1 %v460_v3  ;;  %3191 = vmatprep.subr.mxu0 %v460_v3  ;;  %v711_v32 = vld [vmem:[%s5069_s6 + $0xa0] sm:$0xff]  ;;  %v712_v33 = vld [vmem:[%s5069_s6 + $0xa8] sm:$0xff]  ;;  %v713_v34 = vld [vmem:[%s5069_s6 + $0xb0] sm:$0xff] }
  0x27   : > { %3212 = vmatpush3.msra.mxu1 %v460_v3  ;;  %3192 = vmatpush3.msra.mxu0 %v460_v3  ;;  %v714_v35 = vld [vmem:[%s5069_s6 + $0xb8] sm:$0xff]  ;;  %v715_v36 = vld [vmem:[%s5069_s6 + $0xc0] sm:$0xff]  ;;  %v716_v37 = vld [vmem:[%s5069_s6 + $0xc8] sm:$0xff] }
  0x28   : > { %3213 = vmatprep.subr.mxu1 %v459_v4  ;;  %3193 = vmatprep.subr.mxu0 %v459_v4  ;;  %v717_v38 = vld [vmem:[%s5069_s6 + $0xd0] sm:$0xff]  ;;  %v718_v39 = vld [vmem:[%s5069_s6 + $0xd8] sm:$0xff]  ;;  %v719_v40 = vld [vmem:[%s5069_s6 + $0xe0] sm:$0xff] }
  0x29   : > { %3214 = vmatpush3.msra.mxu1 %v459_v4  ;;  %3194 = vmatpush3.msra.mxu0 %v459_v4  ;;  %v720_v41 = vld [vmem:[%s5069_s6 + $0xe8] sm:$0xff]  ;;  %v721_v42 = vld [vmem:[%s5069_s6 + $0xf0] sm:$0xff]  ;;  %v722_v43 = vld [vmem:[%s5069_s6 + $0xf8] sm:$0xff] }
  0x2a   : > { %3216 = vmatmul.mubr.msk.f32.vlgmr.msra.gmra.mxu1 %vm5074_vm0, %v692_v5  ;;  %3196 = vmatmul.mubr.msk.f32.vlgmr.msra.gmra.mxu0 %vm5074_vm0, %v554_v12  ;;  %v723_v44 = vld [vmem:[%s5069_s6 + $0x100] sm:$0xff]  ;;  %v724_v45 = vld [vmem:[%s5069_s6 + $0x108] sm:$0xff]  ;;  %v725_v46 = vld [vmem:[%s5069_s6 + $0x110] sm:$0xff] }
  0x2b   : > { %3218 = vmatprep.mubr.msk.f32.mxu1 %vm5074_vm0, %v693_v6  ;;  %3198 = vmatprep.mubr.msk.f32.mxu0 %vm5074_vm0, %v555_v13  ;;  %v726_v47 = vld [vmem:[%s5069_s6 + $0x118] sm:$0xff]  ;;  %v727_v48 = vld [vmem:[%s5069_s6 + $0x120] sm:$0xff]  ;;  %v728_v49 = vld [vmem:[%s5069_s6 + $0x128] sm:$0xff] }
  0x2c   : > { %v729_v50 = vld [vmem:[%s5069_s6 + $0x130] sm:$0xff]  ;;  %v730_v51 = vld [vmem:[%s5069_s6 + $0x138] sm:$0xf]  ;;  %1175 = vmatprep.subr.mxu0 %v3659_v52  ;;  %3457 = vmatprep.subr.mxu1 %v3659_v52  ;;  %v482_v54 = vld [vmem:[%s3949_s20 + $0x8] sm:$0xff] }
  0x2d   : > { %v515_v53 = vld [vmem:[%s3949_s20 + $0x110] sm:$0xff] }
  0x2e   : > { %3219 = vmatmul.mubr.msk.f32.gmra.mxu1 %vm5074_vm0, %v694_v7  ;;  %3199 = vmatmul.mubr.msk.f32.gmra.mxu0 %vm5074_vm0, %v556_v14 }
  0x2f   : > { %3221 = vmatprep.mubr.msk.f32.mxu1 %vm5074_vm0, %v695_v8  ;;  %3201 = vmatprep.mubr.msk.f32.mxu0 %vm5074_vm0, %v557_v16 }
  0x32   : > { %3222 = vmatmul.mubr.msk.f32.gmra.mxu1 %vm5074_vm0, %v696_v9  ;;  %3202 = vmatmul.mubr.msk.f32.gmra.mxu0 %vm5074_vm0, %v558_v18 }
  0x33   : > { %3224 = vmatprep.mubr.msk.f32.mxu1 %vm5074_vm0, %v697_v11  ;;  %3204 = vmatprep.mubr.msk.f32.mxu0 %vm5074_vm0, %v559_v20 }
  0x36   : > { %3225 = vmatmul.mubr.msk.f32.gmra.mxu1 %vm5074_vm0, %v698_v15  ;;  %3205 = vmatmul.mubr.msk.f32.gmra.mxu0 %vm5074_vm0, %v560_v22 }
  0x37   : > { %3227 = vmatprep.mubr.msk.f32.mxu1 %vm5074_vm0, %v699_v17  ;;  %1239 = vmatprep.mubr.f32.mxu0 %v482_v54  ;;  %v526_v54 = vld [vmem:[%s3949_s20 + $0x168] sm:$0xff] }
  0x3a   : > { %3228 = vmatmul.mubr.msk.f32.gmra.mxu1 %vm5074_vm0, %v700_v19 }
  0x3b   : > { %3230 = vmatprep.mubr.msk.f32.mxu1 %vm5074_vm0, %v701_v21 }
  0x3e   : > { %3231 = vmatmul.mubr.msk.f32.gmra.mxu1 %vm5074_vm0, %v702_v23 }
  0x3f   : > { %3233 = vmatprep.mubr.msk.f32.mxu1 %vm5074_vm0, %v703_v24 }
  0x42   : > { %3234 = vmatmul.mubr.msk.f32.gmra.mxu1 %vm5074_vm0, %v704_v25 }
  0x43   : > { %3236 = vmatprep.mubr.msk.f32.mxu1 %vm5074_vm0, %v705_v26 }
  0x46   : > { %3237 = vmatmul.mubr.msk.f32.gmra.mxu1 %vm5074_vm0, %v706_v27 }
  0x47   : > { %3239 = vmatprep.mubr.msk.f32.mxu1 %vm5074_vm0, %v707_v28 }
  0x4a   : > { %3240 = vmatmul.mubr.msk.f32.gmra.mxu1 %vm5074_vm0, %v708_v29 }
  0x4b   : > { %3242 = vmatprep.mubr.msk.f32.mxu1 %vm5074_vm0, %v709_v30 }
  0x4e   : > { %3243 = vmatmul.mubr.msk.f32.gmra.mxu1 %vm5074_vm0, %v710_v31 }
  0x4f   : > { %3245 = vmatprep.mubr.msk.f32.mxu1 %vm5074_vm0, %v711_v32  ;;  %v514_v32 = vld [vmem:[%s3949_s20 + $0x108] sm:$0xff] }
  0x52   : > { %3246 = vmatmul.mubr.msk.f32.gmra.mxu1 %vm5074_vm0, %v712_v33 }
  0x53   : > { %3248 = vmatprep.mubr.msk.f32.mxu1 %vm5074_vm0, %v713_v34  ;;  %v518_v34 = vld [vmem:[%s3949_s20 + $0x128] sm:$0xff] }
  0x56   : > { %3249 = vmatmul.mubr.msk.f32.gmra.mxu1 %vm5074_vm0, %v714_v35 }
  0x57   : > { %3251 = vmatprep.mubr.msk.f32.mxu1 %vm5074_vm0, %v715_v36  ;;  %v481_v36 = vld [vmem:[%s3949_s20] sm:$0xff] }
  0x5a   : > { %3252 = vmatmul.mubr.msk.f32.gmra.mxu1 %vm5074_vm0, %v716_v37  ;;  %v485_v37 = vld [vmem:[%s3949_s20 + $0x20] sm:$0xff] }
  0x5b   : > { %3254 = vmatprep.mubr.msk.f32.mxu1 %vm5074_vm0, %v717_v38  ;;  %v517_v38 = vld [vmem:[%s3949_s20 + $0x120] sm:$0xff] }
  0x5e   : > { %3255 = vmatmul.mubr.msk.f32.gmra.mxu1 %vm5074_vm0, %v718_v39 }
  0x5f   : > { %3257 = vmatprep.mubr.msk.f32.mxu1 %vm5074_vm0, %v719_v40  ;;  %v521_v40 = vld [vmem:[%s3949_s20 + $0x140] sm:$0xff] }
  0x62   : > { %3258 = vmatmul.mubr.msk.f32.gmra.mxu1 %vm5074_vm0, %v720_v41  ;;  %v484_v41 = vld [vmem:[%s3949_s20 + $0x18] sm:$0xff] }
  0x63   : > { %3260 = vmatprep.mubr.msk.f32.mxu1 %vm5074_vm0, %v721_v42  ;;  %v488_v42 = vld [vmem:[%s3949_s20 + $0x38] sm:$0xff] }
  0x66   : > { %3261 = vmatmul.mubr.msk.f32.gmra.mxu1 %vm5074_vm0, %v722_v43  ;;  %v520_v43 = vld [vmem:[%s3949_s20 + $0x138] sm:$0xff] }
  0x67   : > { %3263 = vmatprep.mubr.msk.f32.mxu1 %vm5074_vm0, %v723_v44 }
  0x6a   : > { %3264 = vmatmul.mubr.msk.f32.gmra.mxu1 %vm5074_vm0, %v724_v45  ;;  %v524_v45 = vld [vmem:[%s3949_s20 + $0x158] sm:$0xff] }
  0x6b   : > { %3266 = vmatprep.mubr.msk.f32.mxu1 %vm5074_vm0, %v725_v46  ;;  %v487_v46 = vld [vmem:[%s3949_s20 + $0x30] sm:$0xff] }
  0x6e   : > { %3267 = vmatmul.mubr.msk.f32.gmra.mxu1 %vm5074_vm0, %v726_v47  ;;  %v491_v47 = vld [vmem:[%s3949_s20 + $0x50] sm:$0xff] }
  0x6f   : > { %3269 = vmatprep.mubr.msk.f32.mxu1 %vm5074_vm0, %v727_v48  ;;  %v523_v48 = vld [vmem:[%s3949_s20 + $0x150] sm:$0xff] }
  0x72   : > { %3270 = vmatmul.mubr.msk.f32.gmra.mxu1 %vm5074_vm0, %v728_v49 }
  0x73   : > { %3272 = vmatprep.mubr.msk.f32.mxu1 %vm5074_vm0, %v729_v50  ;;  %v527_v50 = vld [vmem:[%s3949_s20 + $0x170] sm:$0xff] }
  0x76   : > { %3273 = vmatmul.mubr.msk.f32.gmra.mxu1 %vm5074_vm0, %v730_v51  ;;  %v490_v51 = vld [vmem:[%s3949_s20 + $0x48] sm:$0xff] }
  0x77   : > { %1294 = vmatprep.mubr.f32.mxu1 %v515_v53  ;;  %v494_v53 = vld [vmem:[%s3949_s20 + $0x68] sm:$0xff] }
  0xea   : > { %v3953_v55 = vpop.f32.mrf.mxu1  ;;  %v4055_v28 = vpop.f32.mrf.mxu0 }
  0xec   : > { %v3955_v56 = vpop.f32.mrf.mxu1  ;;  %v4065_v30 = vpop.f32.mrf.mxu0 }
  0xee   : > { %v3957_v57 = vpop.f32.mrf.mxu1  ;;  %v4076_v33 = vpop.f32.mrf.mxu0 }
  0xf0   : > { %v3959_v58 = vpop.f32.mrf.mxu1  ;;  %v4086_v39 = vpop.f32.mrf.mxu0 }
  0xf2   : > { %v3223_v59 = vpop.f32.mrf.mxu1  ;;  %v4092_v44 = vpop.f32.mrf.mxu0 }
  0xf4   : > { %v3961_v60 = vpop.f32.mrf.mxu1  ;;  %v4100_v49 = vpop.f32.mrf.mxu0 }
  0xf6   : > { %v3226_v61 = vpop.f32.mrf.mxu1 }
  0xf8   : > { %v947_v62 = vpop.f32.mrf.mxu1 }
  0xfa   : > { %v3229_v63 = vpop.f32.mrf.mxu1 }
  0xfc   : > { %v957_v0 = vpop.f32.mrf.mxu1 }
  0xfe   : > { %v3232_v1 = vpop.f32.mrf.mxu1 }
 0x100   : > { %v967_v2 = vpop.f32.mrf.mxu1 }
 0x102   : > { %v3235_v3 = vpop.f32.mrf.mxu1 }
 0x104   : > { %v977_v4 = vpop.f32.mrf.mxu1 }
 0x106   : > { %v3238_v5 = vpop.f32.mrf.mxu1 }
 0x107   : > { %1176 = vmatpush1.msra.mxu0 %v3238_v5  ;;  %3489 = vmatpush1.msra.mxu1 %v3238_v5 }
 0x108   : > { %v987_v6 = vpop.f32.mrf.mxu1  ;;  %1177 = vmatprep.subr.mxu0 %v3659_v52  ;;  %3458 = vmatprep.subr.mxu1 %v3659_v52 }
 0x109   : > { %1178 = vmatpush1.msra.mxu0 %v987_v6  ;;  %3490 = vmatpush1.msra.mxu1 %v987_v6  ;;  %v502_v6 = vld [vmem:[%s3949_s20 + $0xa8] sm:$0xff] }
 0x10a   : > { %v3965_v7 = vpop.f32.mrf.mxu1  ;;  %1179 = vmatprep.subr.mxu0 %v3659_v52  ;;  %3459 = vmatprep.subr.mxu1 %v3659_v52 }
 0x10b   : > { %1180 = vmatpush1.msra.mxu0 %v3235_v3  ;;  %3491 = vmatpush1.msra.mxu1 %v3235_v3  ;;  %v486_v3 = vld [vmem:[%s3949_s20 + $0x28] sm:$0xff] }
 0x10c   : > { %v3969_v8 = vpop.f32.mrf.mxu1  ;;  %1181 = vmatprep.subr.mxu0 %v3659_v52  ;;  %3460 = vmatprep.subr.mxu1 %v3659_v52 }
 0x10d   : > { %1182 = vmatpush1.msra.mxu0 %v977_v4  ;;  %3492 = vmatpush1.msra.mxu1 %v977_v4  ;;  %v489_v4 = vld [vmem:[%s3949_s20 + $0x40] sm:$0xff] }
 0x10e   : > { %v3973_v9 = vpop.f32.mrf.mxu1  ;;  %1183 = vmatprep.subr.mxu0 %v3659_v52  ;;  %3461 = vmatprep.subr.mxu1 %v3659_v52 }
 0x10f   : > { %1184 = vmatpush1.msra.mxu0 %v3232_v1  ;;  %3493 = vmatpush1.msra.mxu1 %v3232_v1  ;;  %v499_v1 = vld [vmem:[%s3949_s20 + $0x90] sm:$0xff] }
 0x110   : > { %v3977_v10 = vpop.f32.mrf.mxu1  ;;  %1185 = vmatprep.subr.mxu0 %v3659_v52  ;;  %3462 = vmatprep.subr.mxu1 %v3659_v52 }
 0x111   : > { %1186 = vmatpush1.msra.mxu0 %v967_v2  ;;  %3494 = vmatpush1.msra.mxu1 %v967_v2  ;;  %v503_v2 = vld [vmem:[%s3949_s20 + $0xb0] sm:$0xff] }
 0x112   : > { %v3981_v11 = vpop.f32.mrf.mxu1  ;;  %1187 = vmatprep.subr.mxu0 %v3659_v52  ;;  %3463 = vmatprep.subr.mxu1 %v3659_v52 }
 0x113   : > { %1188 = vmatpush1.msra.mxu0 %v3229_v63  ;;  %3495 = vmatpush1.msra.mxu1 %v3229_v63  ;;  %v532_v63 = vld [vmem:[%s3949_s20 + $0x198] sm:$0xff] }
 0x114   : > { %v3985_v12 = vpop.f32.mrf.mxu1  ;;  %1189 = vmatprep.subr.mxu0 %v3659_v52  ;;  %3464 = vmatprep.subr.mxu1 %v3659_v52 }
 0x115   : > { %1190 = vmatpush1.msra.mxu0 %v957_v0  ;;  %3496 = vmatpush1.msra.mxu1 %v957_v0  ;;  %v483_v0 = vld [vmem:[%s3949_s20 + $0x10] sm:$0xff] }
 0x116   : > { %v3989_v13 = vpop.f32.mrf.mxu1  ;;  %1191 = vmatprep.subr.mxu0 %v3659_v52  ;;  %3465 = vmatprep.subr.mxu1 %v3659_v52 }
 0x117   : > { %1192 = vmatpush1.msra.mxu0 %v3226_v61  ;;  %3497 = vmatpush1.msra.mxu1 %v3226_v61  ;;  %v496_v61 = vld [vmem:[%s3949_s20 + $0x78] sm:$0xff] }
 0x118   : > { %v3993_v14 = vpop.f32.mrf.mxu1  ;;  %1193 = vmatprep.subr.mxu0 %v3659_v52  ;;  %3466 = vmatprep.subr.mxu1 %v3659_v52 }
 0x119   : > { %1194 = vmatpush1.msra.mxu0 %v947_v62  ;;  %3498 = vmatpush1.msra.mxu1 %v947_v62  ;;  %v500_v62 = vld [vmem:[%s3949_s20 + $0x98] sm:$0xff] }
 0x11a   : > { %v3253_v15 = vpop.f32.mrf.mxu1  ;;  %1195 = vmatprep.subr.mxu0 %v3659_v52  ;;  %3467 = vmatprep.subr.mxu1 %v3659_v52 }
 0x11b   : > { %1196 = vmatpush1.msra.mxu0 %v3223_v59  ;;  %3499 = vmatpush1.msra.mxu1 %v3223_v59  ;;  %v529_v59 = vld [vmem:[%s3949_s20 + $0x180] sm:$0xff] }
 0x11c   : > { %v1037_v16 = vpop.f32.mrf.mxu1  ;;  %1197 = vmatprep.subr.mxu0 %v3659_v52  ;;  %3468 = vmatprep.subr.mxu1 %v3659_v52 }
 0x11d   : > { %1198 = vmatpush1.msra.mxu0 %v3961_v60  ;;  %3500 = vmatpush1.msra.mxu1 %v3961_v60  ;;  %v533_v60 = vld [vmem:[%s3949_s20 + $0x1a0] sm:$0xff] }
 0x11e   : > { %v3256_v17 = vpop.f32.mrf.mxu1  ;;  %1199 = vmatprep.subr.mxu0 %v3659_v52  ;;  %3469 = vmatprep.subr.mxu1 %v3659_v52 }
 0x11f   : > { %1200 = vmatpush1.msra.mxu0 %v3957_v57  ;;  %3501 = vmatpush1.msra.mxu1 %v3957_v57  ;;  %v493_v57 = vld [vmem:[%s3949_s20 + $0x60] sm:$0xff] }
 0x120   : > { %v1047_v18 = vpop.f32.mrf.mxu1  ;;  %1201 = vmatprep.subr.mxu0 %v3659_v52  ;;  %3470 = vmatprep.subr.mxu1 %v3659_v52 }
 0x121   : > { %1202 = vmatpush1.msra.mxu0 %v3959_v58  ;;  %3502 = vmatpush1.msra.mxu1 %v3959_v58  ;;  %v497_v58 = vld [vmem:[%s3949_s20 + $0x80] sm:$0xff] }
 0x122   : > { %v3259_v19 = vpop.f32.mrf.mxu1  ;;  %1203 = vmatprep.subr.mxu0 %v3659_v52  ;;  %3471 = vmatprep.subr.mxu1 %v3659_v52 }
 0x123   : > { %1204 = vmatpush1.msra.mxu0 %v3953_v55  ;;  %3503 = vmatpush1.msra.mxu1 %v3953_v55  ;;  %v3206_v55 = vpop.f32.mrf.mxu0 }
 0x124   : > { %v1057_v20 = vpop.f32.mrf.mxu1  ;;  %1205 = vmatprep.subr.mxu0 %v3659_v52  ;;  %3472 = vmatprep.subr.mxu1 %v3659_v52 }
 0x125   : > { %1206 = vmatpush1.msra.mxu0 %v3955_v56  ;;  %3504 = vmatpush1.msra.mxu1 %v3955_v56  ;;  %v530_v56 = vld [vmem:[%s3949_s20 + $0x188] sm:$0xff]  ;;  %v682_v5 = vpop.f32.mrf.mxu0 }
 0x126   : > { %v3262_v21 = vpop.f32.mrf.mxu1  ;;  %1207 = vmatprep.subr.mxu0 %v3659_v52  ;;  %3473 = vmatprep.subr.mxu1 %v3659_v52 }
 0x127   : > { %1208 = vmatpush2.msra.mxu0 %v3262_v21  ;;  %3505 = vmatpush2.msra.mxu1 %v3262_v21  ;;  %v463_v21 = vld [vmem:[%s4159_s23] sm:$0xff] }
 0x128   : > { %v1067_v22 = vpop.f32.mrf.mxu1  ;;  %1209 = vmatprep.subr.mxu0 %v3659_v52  ;;  %3474 = vmatprep.subr.mxu1 %v3659_v52 }
 0x129   : > { %1210 = vmatpush2.msra.mxu0 %v1067_v22  ;;  %3506 = vmatpush2.msra.mxu1 %v1067_v22  ;;  %v516_v22 = vld [vmem:[%s3949_s20 + $0x118] sm:$0xff] }
 0x12a   : > { %1211 = vmatprep.subr.mxu0 %v3659_v52  ;;  %3475 = vmatprep.subr.mxu1 %v3659_v52  ;;  %v4025_v23 = vpop.f32.mrf.mxu1 }
 0x12b   : > { %1212 = vmatpush2.msra.mxu0 %v3259_v19  ;;  %3507 = vmatpush2.msra.mxu1 %v3259_v19  ;;  %v510_v19 = vld [vmem:[%s3949_s20 + $0xe8] sm:$0xff] }
 0x12c   : > { %1213 = vmatprep.subr.mxu0 %v3659_v52  ;;  %3476 = vmatprep.subr.mxu1 %v3659_v52  ;;  %v4029_v24 = vpop.f32.mrf.mxu1 }
 0x12d   : > { %1214 = vmatpush2.msra.mxu0 %v1057_v20  ;;  %3508 = vmatpush2.msra.mxu1 %v1057_v20  ;;  %v513_v20 = vld [vmem:[%s3949_s20 + $0x100] sm:$0xff] }
 0x12e   : > { %1215 = vmatprep.subr.mxu0 %v3659_v52  ;;  %3477 = vmatprep.subr.mxu1 %v3659_v52  ;;  %v4035_v25 = vpop.f32.mrf.mxu1 }
 0x12f   : > { %1216 = vmatpush2.msra.mxu0 %v3256_v17  ;;  %3509 = vmatpush2.msra.mxu1 %v3256_v17  ;;  %v507_v17 = vld [vmem:[%s3949_s20 + $0xd0] sm:$0xff] }
 0x130   : > { %1217 = vmatprep.subr.mxu0 %v3659_v52  ;;  %3478 = vmatprep.subr.mxu1 %v3659_v52  ;;  %v4041_v26 = vpop.f32.mrf.mxu1 }
 0x131   : > { %1218 = vmatpush2.msra.mxu0 %v1047_v18  ;;  %3510 = vmatpush2.msra.mxu1 %v1047_v18  ;;  %v511_v18 = vld [vmem:[%s3949_s20 + $0xf0] sm:$0xff] }
 0x132   : > { %1219 = vmatprep.subr.mxu0 %v3659_v52  ;;  %3479 = vmatprep.subr.mxu1 %v3659_v52  ;;  %v3271_v27 = vpop.f32.mrf.mxu1 }
 0x133   : > { %1220 = vmatpush2.msra.mxu0 %v3253_v15  ;;  %3511 = vmatpush2.msra.mxu1 %v3253_v15  ;;  %v512_v15 = vld [vmem:[%s3949_s20 + $0xf8] sm:$0xff] }
 0x134   : > { %1221 = vmatprep.subr.mxu0 %v3659_v52  ;;  %3480 = vmatprep.subr.mxu1 %v3659_v52  ;;  %v1097_v29 = vpop.f32.mrf.mxu1 }
 0x135   : > { %1222 = vmatpush2.msra.mxu0 %v1037_v16  ;;  %3512 = vmatpush2.msra.mxu1 %v1037_v16  ;;  %v504_v16 = vld [vmem:[%s3949_s20 + $0xb8] sm:$0xff] }
 0x136   : > { %1223 = vmatprep.subr.mxu0 %v3659_v52  ;;  %3481 = vmatprep.subr.mxu1 %v3659_v52  ;;  %v3274_v31 = vpop.f32.mrf.mxu1 }
 0x137   : > { %1224 = vmatpush2.msra.mxu0 %v3989_v13  ;;  %3513 = vmatpush2.msra.mxu1 %v3989_v13  ;;  %v501_v13 = vld [vmem:[%s3949_s20 + $0xa0] sm:$0xff] }
 0x138   : > { %1225 = vmatprep.subr.mxu0 %v3659_v52  ;;  %3482 = vmatprep.subr.mxu1 %v3659_v52  ;;  %v1107_v35 = vpop.f32.mrf.mxu1 }
 0x139   : > { %1226 = vmatpush2.msra.mxu0 %v3993_v14  ;;  %3514 = vmatpush2.msra.mxu1 %v3993_v14  ;;  %v508_v14 = vld [vmem:[%s3949_s20 + $0xd8] sm:$0xff] }
 0x13a   : > { %1227 = vmatprep.subr.mxu0 %v3659_v52  ;;  %3483 = vmatprep.subr.mxu1 %v3659_v52 }
 0x13b   : > { %1228 = vmatpush2.msra.mxu0 %v3981_v11  ;;  %3515 = vmatpush2.msra.mxu1 %v3981_v11  ;;  %v509_v11 = vld [vmem:[%s3949_s20 + $0xe0] sm:$0xff] }
 0x13c   : > { %1229 = vmatprep.subr.mxu0 %v3659_v52  ;;  %3484 = vmatprep.subr.mxu1 %v3659_v52 }
 0x13d   : > { %1230 = vmatpush2.msra.mxu0 %v3985_v12  ;;  %3516 = vmatpush2.msra.mxu1 %v3985_v12  ;;  %v498_v12 = vld [vmem:[%s3949_s20 + $0x88] sm:$0xff] }
 0x13e   : > { %1231 = vmatprep.subr.mxu0 %v3659_v52  ;;  %3485 = vmatprep.subr.mxu1 %v3659_v52 }
 0x13f   : > { %1232 = vmatpush2.msra.mxu0 %v3973_v9  ;;  %3517 = vmatpush2.msra.mxu1 %v3973_v9  ;;  %v495_v9 = vld [vmem:[%s3949_s20 + $0x70] sm:$0xff] }
 0x140   : > { %1233 = vmatprep.subr.mxu0 %v3659_v52  ;;  %3486 = vmatprep.subr.mxu1 %v3659_v52 }
 0x141   : > { %1234 = vmatpush2.msra.mxu0 %v3977_v10  ;;  %3518 = vmatpush2.msra.mxu1 %v3977_v10  ;;  %v505_v10 = vld [vmem:[%s3949_s20 + $0xc0] sm:$0xff] }
 0x142   : > { %1235 = vmatprep.subr.mxu0 %v3659_v52  ;;  %3487 = vmatprep.subr.mxu1 %v3659_v52 }
 0x143   : > { %1236 = vmatpush2.msra.mxu0 %v3965_v7  ;;  %3519 = vmatpush2.msra.mxu1 %v3965_v7  ;;  %v506_v7 = vld [vmem:[%s3949_s20 + $0xc8] sm:$0xff] }
 0x144   : > { %1237 = vmatprep.subr.mxu0 %v3659_v52  ;;  %3488 = vmatprep.subr.mxu1 %v3659_v52 }
 0x145   : > { %1238 = vmatpush2.msra.mxu0 %v3969_v8  ;;  %3520 = vmatpush2.msra.mxu1 %v3969_v8  ;;  %v492_v8 = vld [vmem:[%s3949_s20 + $0x58] sm:$0xff] }
 0x146   : > { %1295 = vmatmul.mubr.f32.vlgmr.msra.gmra.mxu1 %v514_v32  ;;  %3275 = vmatprep.subr.msk.mxu1 %vm1171_vm1, %v3274_v31  ;;  %v467_v32 = vld [vmem:[%s4159_s23 + $0x20] sm:$0xff] }
 0x147   : > { %3276 = vmatpush3.msk.msra.mxu1 %vm1171_vm1, %v3274_v31  ;;  %1299 = vmatprep.mubr.f32.mxu1 %v518_v34  ;;  %v466_v31 = vld [vmem:[%s4159_s23 + $0x18] sm:$0xff]  ;;  %v469_v34 = vld [vmem:[%s4159_s23 + $0x30] sm:$0xff] }
 0x148   : > { %3277 = vmatprep.subr.mxu1 %v1107_v35  ;;  %1240 = vmatmul.mubr.f32.vlgmr.msra.gmra.mxu0 %v481_v36  ;;  %v471_v36 = vld [vmem:[%s4159_s23 + $0x40] sm:$0xff] }
 0x149   : > { %3278 = vmatpush3.msra.mxu1 %v1107_v35  ;;  %1244 = vmatprep.mubr.f32.mxu0 %v485_v37  ;;  %v470_v35 = vld [vmem:[%s4159_s23 + $0x38] sm:$0xff]  ;;  %v472_v37 = vld [vmem:[%s4159_s23 + $0x48] sm:$0xff] }
 0x14a   : > { %1300 = vmatmul.mubr.f32.gmra.mxu1 %v517_v38  ;;  %3279 = vmatprep.subr.mxu1 %v3271_v27  ;;  %v4207_v38 = vld [vmem:[%s4159_s23 + $0x50] sm:$0xff] }
 0x14b   : > { %3280 = vmatpush3.msra.mxu1 %v3271_v27  ;;  %1304 = vmatprep.mubr.f32.mxu1 %v521_v40  ;;  %v531_v27 = vld [vmem:[%s3949_s20 + $0x190] sm:$0xff]  ;;  %v4216_v40 = vld [vmem:[%s4159_s23 + $0x60] sm:$0xff] }
 0x14c   : > { %3281 = vmatprep.subr.mxu1 %v1097_v29  ;;  %1245 = vmatmul.mubr.f32.gmra.mxu0 %v484_v41  ;;  %v4223_v41 = vld [vmem:[%s4159_s23 + $0x68] sm:$0xff] }
 0x14d   : > { %3282 = vmatpush3.msra.mxu1 %v1097_v29  ;;  %1249 = vmatprep.mubr.f32.mxu0 %v488_v42  ;;  %v464_v29 = vld [vmem:[%s4159_s23 + $0x8] sm:$0xff]  ;;  %v4226_v42 = vld [vmem:[%s4159_s23 + $0x70] sm:$0xff] }
 0x14e   : > { %1305 = vmatmul.mubr.f32.gmra.mxu1 %v520_v43  ;;  %3283 = vmatprep.subr.mxu1 %v4035_v25  ;;  %v4233_v43 = vld [vmem:[%s4159_s23 + $0x78] sm:$0xff] }
 0x14f   : > { %3284 = vmatpush3.msra.mxu1 %v4035_v25  ;;  %1309 = vmatprep.mubr.f32.mxu1 %v524_v45  ;;  %v525_v25 = vld [vmem:[%s3949_s20 + $0x160] sm:$0xff]  ;;  %v4243_v45 = vld [vmem:[%s4159_s23 + $0x88] sm:$0xff] }
 0x150   : > { %3285 = vmatprep.subr.mxu1 %v4041_v26  ;;  %1250 = vmatmul.mubr.f32.gmra.mxu0 %v487_v46  ;;  %v2044_v46 = vld [vmem:[%s5070_s7 + $0x38] sm:$0xff] }
 0x151   : > { %3286 = vmatpush3.msra.mxu1 %v4041_v26  ;;  %1254 = vmatprep.mubr.f32.mxu0 %v491_v47  ;;  %v528_v26 = vld [vmem:[%s3949_s20 + $0x178] sm:$0xff]  ;;  %v2043_v47 = vld [vmem:[%s5070_s7 + $0x30] sm:$0xff] }
 0x152   : > { %1310 = vmatmul.mubr.f32.gmra.mxu1 %v523_v48  ;;  %3287 = vmatprep.subr.mxu1 %v4025_v23  ;;  %v2042_v48 = vld [vmem:[%s5070_s7 + $0x28] sm:$0xff] }
 0x153   : > { %3288 = vmatpush3.msra.mxu1 %v4025_v23  ;;  %1314 = vmatprep.mubr.f32.mxu1 %v527_v50  ;;  %v519_v23 = vld [vmem:[%s3949_s20 + $0x130] sm:$0xff]  ;;  %v2040_v50 = vld [vmem:[%s5070_s7 + $0x18] sm:$0xff] }
 0x154   : > { %3289 = vmatprep.subr.mxu1 %v4029_v24  ;;  %1255 = vmatmul.mubr.f32.gmra.mxu0 %v490_v51  ;;  %v2039_v51 = vld [vmem:[%s5070_s7 + $0x10] sm:$0xff] }
 0x155   : > { %3290 = vmatpush3.msra.mxu1 %v4029_v24  ;;  %1259 = vmatprep.mubr.f32.mxu0 %v494_v53  ;;  %v522_v24 = vld [vmem:[%s3949_s20 + $0x148] sm:$0xff] }
 0x156   : > { %1315 = vmatmul.mubr.f32.gmra.mxu1 %v526_v54  ;;  %3318 = vmatprep.subr.mxu1 %v3206_v55  ;;  %v2038_v53 = vld [vmem:[%s5070_s7 + $0x8] sm:$0xff]  ;;  %v2037_v54 = vld [vmem:[%s5070_s7] sm:$0xff] }
 0x157   : > { %1319 = vmatprep.mubr.f32.mxu1 %v530_v56  ;;  %3361 = vmatprep.subr.mxu0 %v2044_v46 }
 0x158   : > { %1260 = vmatmul.mubr.f32.gmra.mxu0 %v493_v57 }
 0x159   : > { %1264 = vmatprep.mubr.f32.mxu0 %v497_v58  ;;  %3362 = vmatpush3.msra.mxu0 %v2044_v46 }
 0x15a   : > { %1320 = vmatmul.mubr.f32.gmra.mxu1 %v529_v59  ;;  %3363 = vmatprep.subr.mxu0 %v2043_v47 }
 0x15b   : > { %1324 = vmatprep.mubr.f32.mxu1 %v533_v60  ;;  %3364 = vmatpush3.msra.mxu0 %v2043_v47 }
 0x15c   : > { %1265 = vmatmul.mubr.f32.gmra.mxu0 %v496_v61  ;;  %3365 = vmatprep.subr.mxu0 %v2042_v48 }
 0x15d   : > { %1269 = vmatprep.mubr.f32.mxu0 %v500_v62  ;;  %3366 = vmatpush3.msra.mxu0 %v2042_v48 }
 0x15e   : > { %1325 = vmatmul.mubr.f32.gmra.mxu1 %v532_v63 }
 0x15f   : > { %3291 = vmatprep.mubr.msk.f32.mxu1 %vm1116_vm2, %v483_v0 }
 0x160   : > { %1270 = vmatmul.mubr.f32.gmra.mxu0 %v499_v1 }
 0x161   : > { %1274 = vmatprep.mubr.f32.mxu0 %v503_v2 }
 0x162   : > { %3292 = vmatmul.mubr.msk.f32.vlgmr.msra.gmra.mxu1 %vm1116_vm2, %v486_v3 }
 0x163   : > { %3319 = vmatpush3.msra.mxu1 %v3206_v55  ;;  %3294 = vmatprep.mubr.msk.f32.mxu1 %vm1116_vm2, %v489_v4 }
 0x164   : > { %3320 = vmatprep.subr.mxu1 %v682_v5  ;;  %1275 = vmatmul.mubr.f32.gmra.mxu0 %v502_v6 }
 0x165   : > { %3321 = vmatpush3.msra.mxu1 %v682_v5  ;;  %1279 = vmatprep.mubr.f32.mxu0 %v506_v7 }
 0x166   : > { %3322 = vmatprep.subr.mxu1 %v4092_v44  ;;  %3295 = vmatmul.mubr.msk.f32.gmra.mxu1 %vm1116_vm2, %v492_v8 }
 0x167   : > { %3323 = vmatpush3.msra.mxu1 %v4092_v44  ;;  %3297 = vmatprep.mubr.msk.f32.mxu1 %vm1116_vm2, %v495_v9  ;;  %v4236_v44 = vld [vmem:[%s4159_s23 + $0x80] sm:$0xff] }
 0x168   : > { %3324 = vmatprep.subr.mxu1 %v4100_v49  ;;  %1280 = vmatmul.mubr.f32.gmra.mxu0 %v505_v10 }
 0x169   : > { %3325 = vmatpush3.msra.mxu1 %v4100_v49  ;;  %1284 = vmatprep.mubr.f32.mxu0 %v509_v11  ;;  %v2041_v49 = vld [vmem:[%s5070_s7 + $0x20] sm:$0xff] }
 0x16a   : > { %3326 = vmatprep.subr.mxu1 %v4076_v33  ;;  %3298 = vmatmul.mubr.msk.f32.gmra.mxu1 %vm1116_vm2, %v498_v12 }
 0x16b   : > { %3327 = vmatpush3.msra.mxu1 %v4076_v33  ;;  %3300 = vmatprep.mubr.msk.f32.mxu1 %vm1116_vm2, %v501_v13  ;;  %v468_v33 = vld [vmem:[%s4159_s23 + $0x28] sm:$0xff] }
 0x16c   : > { %3328 = vmatprep.subr.mxu1 %v4086_v39  ;;  %1285 = vmatmul.mubr.f32.gmra.mxu0 %v508_v14 }
 0x16d   : > { %3329 = vmatpush3.msra.mxu1 %v4086_v39  ;;  %1289 = vmatprep.mubr.f32.mxu0 %v512_v15  ;;  %v4213_v39 = vld [vmem:[%s4159_s23 + $0x58] sm:$0xff] }
 0x16e   : > { %3330 = vmatprep.subr.mxu1 %v4055_v28  ;;  %3301 = vmatmul.mubr.msk.f32.gmra.mxu1 %vm1116_vm2, %v504_v16 }
 0x16f   : > { %3331 = vmatpush3.msra.mxu1 %v4055_v28  ;;  %3303 = vmatprep.mubr.msk.f32.mxu1 %vm1116_vm2, %v507_v17  ;;  %v534_v28 = vld [vmem:[%s3949_s20 + $0x1a8] sm:$0xff]  ;;  %s5022_s20 = scalar_lea.vmem %s5072_s9, %s4147_s14 }
 0x170   : > { %3332 = vmatprep.subr.mxu1 %v4065_v30  ;;  %1290 = vmatmul.mubr.f32.gmra.mxu0 %v511_v18 }
 0x171   : > { %3333 = vmatpush3.msra.mxu1 %v4065_v30  ;;  %3377 = vmatprep.mubr.msk.f32.mxu0 %vm1485_vm3, %v463_v21  ;;  %v465_v30 = vld [vmem:[%s4159_s23 + $0x10] sm:$0xff] }
 0x172   : > { %3304 = vmatmul.mubr.msk.f32.gmra.mxu1 %vm1116_vm2, %v510_v19  ;;  %3367 = vmatprep.subr.mxu0 %v2041_v49 }
 0x173   : > { %3306 = vmatprep.mubr.msk.f32.mxu1 %vm1116_vm2, %v513_v20  ;;  %3368 = vmatpush3.msra.mxu0 %v2041_v49 }
 0x174   : > { %3369 = vmatprep.subr.mxu0 %v2040_v50 }
 0x175   : > { %3370 = vmatpush3.msra.mxu0 %v2040_v50 }
 0x176   : > { %3307 = vmatmul.mubr.msk.f32.gmra.mxu1 %vm1116_vm2, %v516_v22  ;;  %3371 = vmatprep.subr.mxu0 %v2039_v51 }
 0x177   : > { %3309 = vmatprep.mubr.msk.f32.mxu1 %vm1116_vm2, %v519_v23  ;;  %3372 = vmatpush3.msra.mxu0 %v2039_v51 }
 0x178   : > { %3373 = vmatprep.subr.mxu0 %v2038_v53 }
 0x179   : > { %3374 = vmatpush3.msra.mxu0 %v2038_v53 }
 0x17a   : > { %3310 = vmatmul.mubr.msk.f32.gmra.mxu1 %vm1116_vm2, %v522_v24  ;;  %3375 = vmatprep.subr.mxu0 %v2037_v54 }
 0x17b   : > { %3312 = vmatprep.mubr.msk.f32.mxu1 %vm1116_vm2, %v525_v25  ;;  %3376 = vmatpush3.msra.mxu0 %v2037_v54 }
 0x17c   : > { %3378 = vmatmul.mubr.msk.f32.vlgmr.msra.gmra.mxu0 %vm1485_vm3, %v464_v29  ;;  %2536 = vmatprep.subr.mxu0 %v3659_v52 }
 0x17d   : > { %3380 = vmatprep.mubr.msk.f32.mxu0 %vm1485_vm3, %v465_v30 }
 0x17e   : > { %3313 = vmatmul.mubr.msk.f32.gmra.mxu1 %vm1116_vm2, %v528_v26 }
 0x17f   : > { %3315 = vmatprep.mubr.msk.f32.mxu1 %vm1116_vm2, %v531_v27 }
 0x180   : > { %3381 = vmatmul.mubr.msk.f32.gmra.mxu0 %vm1485_vm3, %v466_v31 }
 0x181   : > { %3383 = vmatprep.mubr.msk.f32.mxu0 %vm1485_vm3, %v467_v32 }
 0x182   : > { %3316 = vmatmul.mubr.msk.f32.gmra.mxu1 %vm1116_vm2, %v534_v28 }
 0x183   : > { %3334 = vmatprep.mubr.msk.f32.mxu1 %vm1485_vm3, %v463_v21 }
 0x184   : > { %3384 = vmatmul.mubr.msk.f32.gmra.mxu0 %vm1485_vm3, %v468_v33 }
 0x185   : > { %3386 = vmatprep.mubr.msk.f32.mxu0 %vm1485_vm3, %v469_v34 }
 0x186   : > { %3335 = vmatmul.mubr.msk.f32.vlgmr.msra.gmra.mxu1 %vm1485_vm3, %v464_v29 }
 0x187   : > { %3337 = vmatprep.mubr.msk.f32.mxu1 %vm1485_vm3, %v465_v30 }
 0x188   : > { %3387 = vmatmul.mubr.msk.f32.gmra.mxu0 %vm1485_vm3, %v470_v35 }
 0x189   : > { %3389 = vmatprep.mubr.msk.f32.mxu0 %vm1485_vm3, %v471_v36 }
 0x18a   : > { %3338 = vmatmul.mubr.msk.f32.gmra.mxu1 %vm1485_vm3, %v466_v31 }
 0x18b   : > { %3340 = vmatprep.mubr.msk.f32.mxu1 %vm1485_vm3, %v467_v32 }
 0x18c   : > { %3390 = vmatmul.mubr.msk.f32.gmra.mxu0 %vm1485_vm3, %v472_v37 }
 0x18d   : > { %3392 = vmatprep.mubr.msk.f32.mxu0 %vm1485_vm3, %v4207_v38 }
 0x18e   : > { %3341 = vmatmul.mubr.msk.f32.gmra.mxu1 %vm1485_vm3, %v468_v33 }
 0x18f   : > { %3343 = vmatprep.mubr.msk.f32.mxu1 %vm1485_vm3, %v469_v34 }
 0x190   : > { %3393 = vmatmul.mubr.msk.f32.gmra.mxu0 %vm1485_vm3, %v4213_v39 }
 0x191   : > { %3395 = vmatprep.mubr.msk.f32.mxu0 %vm1485_vm3, %v4216_v40 }
 0x192   : > { %3344 = vmatmul.mubr.msk.f32.gmra.mxu1 %vm1485_vm3, %v470_v35 }
 0x193   : > { %3346 = vmatprep.mubr.msk.f32.mxu1 %vm1485_vm3, %v471_v36 }
 0x194   : > { %3396 = vmatmul.mubr.msk.f32.gmra.mxu0 %vm1485_vm3, %v4223_v41 }
 0x195   : > { %3398 = vmatprep.mubr.msk.f32.mxu0 %vm1485_vm3, %v4226_v42 }
 0x196   : > { %3347 = vmatmul.mubr.msk.f32.gmra.mxu1 %vm1485_vm3, %v472_v37 }
 0x197   : > { %3349 = vmatprep.mubr.msk.f32.mxu1 %vm1485_vm3, %v4207_v38  ;;  %v1713_v38 = vlaneseq }
 0x198   : > { %3399 = vmatmul.mubr.msk.f32.gmra.mxu0 %vm1485_vm3, %v4233_v43 }
 0x199   : > { %3401 = vmatprep.mubr.msk.f32.mxu0 %vm1485_vm3, %v4236_v44 }
 0x19a   : > { %3350 = vmatmul.mubr.msk.f32.gmra.mxu1 %vm1485_vm3, %v4213_v39 }
 0x19b   : > { %3352 = vmatprep.mubr.msk.f32.mxu1 %vm1485_vm3, %v4216_v40 }
 0x19c   : > { %3402 = vmatmul.mubr.msk.f32.gmra.mxu0 %vm1485_vm3, %v4243_v45 }
 0x19e   : > { %3353 = vmatmul.mubr.msk.f32.gmra.mxu1 %vm1485_vm3, %v4223_v41  ;;  %v1733_v41 = vand.u32 127, %v1713_v38 }
 0x19f   : > { %3355 = vmatprep.mubr.msk.f32.mxu1 %vm1485_vm3, %v4226_v42 }
 0x1a2   : > { %3356 = vmatmul.mubr.msk.f32.gmra.mxu1 %vm1485_vm3, %v4233_v43 }
 0x1a3   : > { %3358 = vmatprep.mubr.msk.f32.mxu1 %vm1485_vm3, %v4236_v44  ;;  %v4353_v44 = vshrl.u32 %v1713_v38, 7 }
 0x1a5   : > { %v1715_v48 = vadd.s32 8, %v4353_v44  ;;  %v1717_v51 = vadd.s32 24, %v4353_v44  ;;  %v4369_v53 = vadd.s32 16, %v4353_v44  ;;  %v4457_v38 = vadd.s32 104, %v4353_v44 }
 0x1a6   : > { %3359 = vmatmul.mubr.msk.f32.gmra.mxu1 %vm1485_vm3, %v4243_v45  ;;  %v4355_v45 = vmul.u32 36, %v1733_v41 }
 0x1a8   : > { %v4363_v49 = vadd.s32 36, %v4355_v45  ;;  %vm1736_vm4 = vcmp.ge.s32.totalorder %v1715_v48, %v4355_v45  ;;  %vm1735_vm6 = vcmp.ge.s32.totalorder %v4353_v44, %v4355_v45  ;;  %vm1738_vm8 = vcmp.ge.s32.totalorder %v1717_v51, %v4355_v45 }
 0x1a9   : > { %vm1737_vm10 = vcmp.ge.s32.totalorder %v4369_v53, %v4355_v45 }
 0x1aa   : > { %vm1755_vm5 = vcmp.lt.s32.totalorder %v1715_v48, %v4363_v49  ;;  %vm1754_vm7 = vcmp.lt.s32.totalorder %v4353_v44, %v4363_v49  ;;  %vm1757_vm9 = vcmp.lt.s32.totalorder %v1717_v51, %v4363_v49  ;;  %vm1756_vm12 = vcmp.lt.s32.totalorder %v4369_v53, %v4363_v49 }
 0x1ab   : > { %vm4419_vm2 = vmand %vm1736_vm4, %vm1755_vm5 }
 0x1ac   : > { %vm4437_vm4 = vmand %vm1735_vm6, %vm1754_vm7 }
 0x206   : > { %v4275_v55 = vpop.f32.mrf.mxu1 }
 0x208   : > { %v1298_v56 = vpop.f32.mrf.mxu1  ;;  %v4278_v57 = vpop.f32.mrf.mxu0 }
 0x209   : > { %v1719_v56 = vadd.s32 40, %v4353_v44 }
 0x20a   : > { %v4281_v58 = vpop.f32.mrf.mxu1  ;;  %v1243_v59 = vpop.f32.mrf.mxu0 }
 0x20b   : > { %vm1740_vm13 = vcmp.ge.s32.totalorder %v1719_v56, %v4355_v45  ;;  %vm1759_vm14 = vcmp.lt.s32.totalorder %v1719_v56, %v4363_v49 }
 0x20c   : > { %v1303_v60 = vpop.f32.mrf.mxu1  ;;  %v4284_v61 = vpop.f32.mrf.mxu0  ;;  %vm4448_vm5 = vmand %vm1740_vm13, %vm1759_vm14 }
 0x20d   : > { %v1718_v60 = vadd.s32 32, %v4353_v44  ;;  %vm4469_vm13 = vmand %vm1738_vm8, %vm1757_vm9 }
 0x20e   : > { %v4287_v62 = vpop.f32.mrf.mxu1  ;;  %v1248_v63 = vpop.f32.mrf.mxu0  ;;  %vm4500_vm9 = vmand %vm1737_vm10, %vm1756_vm12  ;;  %vm5088_vm10 = vcmask 31744  }
 0x20f   : > { %v4379_v63 = vadd.s32 56, %v4353_v44  ;;  %vm1739_vm15 = vcmp.ge.s32.totalorder %v1718_v60, %v4355_v45  ;;  %vm1758_vm1 = vcmp.lt.s32.totalorder %v1718_v60, %v4363_v49  ;;  %vm5089_vm12 = vmmov %vm5088_vm10 }
 0x210   : > { %v1308_v0 = vpop.f32.mrf.mxu1  ;;  %v4290_v1 = vpop.f32.mrf.mxu0 }
 0x212   : > { %v4293_v2 = vpop.f32.mrf.mxu1  ;;  %v1253_v3 = vpop.f32.mrf.mxu0 }
 0x214   : > { %v1313_v4 = vpop.f32.mrf.mxu1  ;;  %v4297_v5 = vpop.f32.mrf.mxu0 }
 0x215   : > { %v4391_v4 = vadd.s32 48, %v4353_v44 }
 0x216   : > { %v4301_v6 = vpop.f32.mrf.mxu1  ;;  %v1258_v7 = vpop.f32.mrf.mxu0 }
 0x217   : > { %vm1760_vm3 = vcmp.lt.s32.totalorder %v4391_v4, %v4363_v49 }
 0x218   : > { %v1318_v8 = vpop.f32.mrf.mxu1  ;;  %v4305_v9 = vpop.f32.mrf.mxu0 }
 0x21a   : > { %v4309_v10 = vpop.f32.mrf.mxu1  ;;  %v1263_v11 = vpop.f32.mrf.mxu0 }
 0x21b   : > { %v4397_v11 = vadd.s32 72, %v4353_v44 }
 0x21c   : > { %v1323_v12 = vpop.f32.mrf.mxu1  ;;  %v4313_v13 = vpop.f32.mrf.mxu0 }
 0x21d   : > { %vm1744_vm11 = vcmp.ge.s32.totalorder %v4397_v11, %v4355_v45  ;;  %vm1763_vm0 = vcmp.lt.s32.totalorder %v4397_v11, %v4363_v49 }
 0x21e   : > { %v4317_v14 = vpop.f32.mrf.mxu1  ;;  %v1268_v15 = vpop.f32.mrf.mxu0 }
 0x220   : > { %v1328_v16 = vpop.f32.mrf.mxu1  ;;  %v4321_v17 = vpop.f32.mrf.mxu0 }
 0x221   : > { %v4407_v16 = vadd.s32 64, %v4353_v44 }
 0x222   : > { %v3293_v18 = vpop.f32.mrf.mxu1  ;;  %v1273_v19 = vpop.f32.mrf.mxu0 }
 0x223   : > { %v1402_v59 = vadd.f32 %v3293_v18, %v4284_v61  ;;  %vm1743_vm6 = vcmp.ge.s32.totalorder %v4407_v16, %v4355_v45  ;;  %vm1762_vm7 = vcmp.lt.s32.totalorder %v4407_v16, %v4363_v49 }
 0x224   : > { %v1396_v20 = vpop.f32.mrf.mxu1  ;;  %v4325_v21 = vpop.f32.mrf.mxu0 }
 0x225   : > { %v1397_v61 = vadd.f32 %v1396_v20, %v4278_v57  ;;  %v4413_v20 = vadd.s32 88, %v4353_v44 }
 0x226   : > { %v3296_v22 = vpop.f32.mrf.mxu1  ;;  %v1278_v23 = vpop.f32.mrf.mxu0 }
 0x227   : > { %v1412_v7 = vadd.f32 %v3296_v22, %v4297_v5  ;;  %vm1746_vm14 = vcmp.ge.s32.totalorder %v4413_v20, %v4355_v45  ;;  %vm1765_vm8 = vcmp.lt.s32.totalorder %v4413_v20, %v4363_v49 }
 0x228   : > { %v1406_v24 = vpop.f32.mrf.mxu1  ;;  %v4327_v25 = vpop.f32.mrf.mxu0 }
 0x229   : > { %v1407_v57 = vadd.f32 %v1406_v24, %v4290_v1 }
 0x22a   : > { %v3299_v26 = vpop.f32.mrf.mxu1  ;;  %v1283_v27 = vpop.f32.mrf.mxu0 }
 0x22b   : > { %v1422_v18 = vadd.f32 %v3299_v26, %v4313_v13 }
 0x22c   : > { %v4329_v28 = vpop.f32.mrf.mxu1  ;;  %v4331_v29 = vpop.f32.mrf.mxu0 }
 0x22d   : > { %v1417_v13 = vadd.f32 %v4329_v28, %v4305_v9 }
 0x22e   : > { %v4333_v30 = vpop.f32.mrf.mxu1  ;;  %v1288_v31 = vpop.f32.mrf.mxu0 }
 0x22f   : > { %v4442_v31 = vadd.s32 80, %v4353_v44  ;;  %v1432_v41 = vadd.f32 %v4333_v30, %v4325_v21 }
 0x230   : > { %v4335_v32 = vpop.f32.mrf.mxu1  ;;  %v4337_v33 = vpop.f32.mrf.mxu0 }
 0x231   : > { %v1427_v21 = vadd.f32 %v4335_v32, %v4321_v17 }
 0x232   : > { %v4339_v34 = vpop.f32.mrf.mxu1  ;;  %v1293_v35 = vpop.f32.mrf.mxu0 }
 0x234   : > { %v4341_v36 = vpop.f32.mrf.mxu1 }
 0x236   : > { %v4343_v37 = vpop.f32.mrf.mxu1 }
 0x237   : > { %v1452_v26 = vadd.f32 %v4343_v37, %v4275_v55 }
 0x238   : > { %v4345_v39 = vpop.f32.mrf.mxu1 }
 0x23a   : > { %v4347_v40 = vpop.f32.mrf.mxu1 }
 0x23c   : > { %v4349_v42 = vpop.f32.mrf.mxu1 }
 0x23e   : > { %v4351_v43 = vpop.f32.mrf.mxu1 }
 0x240   : > { %v4357_v46 = vpop.f32.mrf.mxu1 }
 0x242   : > { %v4359_v47 = vpop.f32.mrf.mxu1 }
 0x244   : > { %v4365_v50 = vpop.f32.mrf.mxu1 }
 0x246   : > { %v3336_v54 = vpop.f32.mrf.mxu1 }
 0x247   : > { %v1612_v3 = vadd.f32 %v3336_v54, %v1402_v59 }
 0x248   : > { %v1606_v0 = vpop.f32.mrf.mxu1 }
 0x249   : > { %v1607_v12 = vadd.f32 %v1606_v0, %v1397_v61  ;;  %v1696_v19 = vmul.f32 0.17677669, %v1612_v3  ;;  %v4488_v61 = vadd.s32 96, %v4353_v44 }
 0x24a   : > { %v3339_v8 = vpop.f32.mrf.mxu1 }
 0x24b   : > { %v1622_v15 = vadd.f32 %v3339_v8, %v1412_v7  ;;  %v1695_v24 = vmul.f32 0.17677669, %v1607_v12  ;;  %v4463_v48 = vsel %vm4419_vm2, %v1696_v19, -1e+30  ;;  %vm4481_vm2 = vmand %vm1739_vm15, %vm1758_vm1  ;;  %vm1764_vm1 = vcmp.lt.s32.totalorder %v4442_v31, %v4363_v49 }
 0x24c   : > { %v1616_v5 = vpop.f32.mrf.mxu1  ;;  %v1442_v8 = vadd.f32 %v4339_v34, %v4331_v29  ;;  %v4516_v53 = vsel %vm5088_vm10, %v4463_v48, -inf  ;;  %v1437_v19 = vadd.f32 %v4341_v36, %v4327_v25 }
 0x24d   : > { %v1617_v22 = vadd.f32 %v1616_v5, %v1407_v57  ;;  %v1698_v35 = vmul.f32 0.17677669, %v1622_v15  ;;  %v4492_v3 = vsel %vm4437_vm4, %v1695_v24, -1e+30  ;;  %vm5090_vm4 = vcmp.lt.s32.totalorder %v4379_v63, %v4363_v49 }
 0x24e   : > { %v3342_v23 = vpop.f32.mrf.mxu1 }
 0x24f   : > { %v1632_v27 = vadd.f32 %v3342_v23, %v1422_v18  ;;  %v1697_v30 = vmul.f32 0.17677669, %v1617_v22  ;;  %v4520_v12 = vsel %vm4469_vm13, %v1698_v35, -1e+30  ;;  %vm1748_vm13 = vcmp.ge.s32.totalorder %v4457_v38, %v4355_v45 }
 0x250   : > { %v1626_v28 = vpop.f32.mrf.mxu1 }
 0x251   : > { %v1700_v56 = vmul.f32 0.17677669, %v1632_v27  ;;  %v1627_v59 = vadd.f32 %v1626_v28, %v1417_v13  ;;  %v4548_v1 = vsel %vm4500_vm9, %v1697_v30, -1e+30  ;;  %vm5094_vm9 = vmmov %vm5088_vm10  ;;  %v1447_v30 = vadd.f32 %v4345_v39, %v4337_v33 }
 0x252   : > { %v3345_v51 = vpop.f32.mrf.mxu1  ;;  %v1812_v27 = vsel %vm5094_vm9, %v4520_v12, -inf }
 0x253   : > { %v4506_v32 = vsel %vm4448_vm5, %v1700_v56, -1e+30  ;;  %v1699_v60 = vmul.f32 0.17677669, %v1627_v59  ;;  %v1642_v7 = vadd.f32 %v3345_v51, %v1432_v41  ;;  %vm5091_vm5 = vcmp.ge.s32.totalorder %v4379_v63, %v4355_v45 }
 0x254   : > { %v4524_v57 = vsel %vm5089_vm12, %v4506_v32, -inf  ;;  %vm1779_vm15 = vmand %vm5091_vm5, %vm5090_vm4  ;;  %v1636_v29 = vpop.f32.mrf.mxu1  ;;  %v4544_v63 = vsel %vm5088_vm10, %v4492_v3, -inf }
 0x255   : > { %v1816_v34 = vmax.f32 %v4516_v53, %v4524_v57  ;;  %v4536_v15 = vsel %vm4481_vm2, %v1699_v60, -1e+30  ;;  %v1702_v5 = vmul.f32 0.17677669, %v1642_v7  ;;  %v1637_v18 = vadd.f32 %v1636_v29, %v1427_v21  ;;  %vm5092_vm12 = vmmov %vm5088_vm10 }
 0x256   : > { %v4552_v22 = vsel %vm5092_vm12, %v4536_v15, -inf  ;;  %vm5093_vm2 = vcmp.ge.s32.totalorder %v4391_v4, %v4355_v45  ;;  %v3348_v25 = vpop.f32.mrf.mxu1  ;;  %vm5095_vm5 = vmmov %vm5094_vm9  ;;  %v1729_v4 = vadd.s32 120, %v4353_v44  ;;  %v1728_v21 = vadd.s32 112, %v4353_v44 }
 0x257   : > { %vm1778_vm4 = vmand %vm5093_vm2, %vm1760_vm3  ;;  %v1814_v36 = vmax.f32 %v4544_v63, %v4552_v22  ;;  %v4562_v23 = vsel %vm1779_vm15, %v1702_v5, -1e+30  ;;  %v1701_v13 = vmul.f32 0.17677669, %v1637_v18  ;;  %v1652_v24 = vadd.f32 %v3348_v25, %v1442_v8 }
 0x258   : > { %v1819_v35 = vsel %vm5095_vm5, %v4562_v23, -inf  ;;  %v1646_v9 = vpop.f32.mrf.mxu1  ;;  %vm4579_vm3 = vmand %vm1744_vm11, %vm1763_vm0  ;;  %vm1767_vm0 = vcmp.lt.s32.totalorder %v4457_v38, %v4363_v49  ;;  %v1462_v60 = vadd.f32 %v4347_v40, %v4287_v62  ;;  %vm1750_vm2 = vcmp.ge.s32.totalorder %v1729_v4, %v4355_v45 }
 0x259   : > { %v1820_v28 = vmax.f32 %v1812_v27, %v1819_v35  ;;  %v4571_v41 = vsel %vm1778_vm4, %v1701_v13, -1e+30  ;;  %v1704_v54 = vmul.f32 0.17677669, %v1652_v24  ;;  %v1647_v37 = vadd.f32 %v1646_v9, %v1437_v19  ;;  %vm5098_vm15 = vmmov %vm5095_vm5 }
 0x25a   : > { %v4585_v56 = vsel %vm5098_vm15, %v4548_v1, -inf  ;;  %vm5099_vm10 = vmmov %vm5095_vm5  ;;  %v3351_v11 = vpop.f32.mrf.mxu1  ;;  %vm1769_vm4 = vcmp.lt.s32.totalorder %v1729_v4, %v4363_v49  ;;  %vm1749_vm9 = vcmp.ge.s32.totalorder %v1728_v21, %v4355_v45  ;;  %vm1768_vm5 = vcmp.lt.s32.totalorder %v1728_v21, %v4363_v49 }
 0x25b   : > { %v4589_v59 = vsel %vm5099_vm10, %v4571_v41, -inf  ;;  %vm1780_vm12 = vmand %vm1743_vm6, %vm1762_vm7  ;;  %v1703_v51 = vmul.f32 0.17677669, %v1647_v37  ;;  %v1662_v17 = vadd.f32 %v3351_v11, %v1452_v26  ;;  %vm1747_vm6 = vcmp.ge.s32.totalorder %v4488_v61, %v4355_v45 }
 0x25c   : > { %v1818_v0 = vmax.f32 %v4585_v56, %v4589_v59  ;;  %vm4612_vm11 = vmand %vm1746_vm14, %vm1765_vm8  ;;  %v1656_v7 = vpop.f32.mrf.mxu1  ;;  %vm1766_vm7 = vcmp.lt.s32.totalorder %v4488_v61, %v4363_v49  ;;  %v4623_v62 = vsel %vm4579_vm3, %v1704_v54, -1e+30  ;;  %vm5102_vm14 = vcmp.ge.s32.totalorder %v4442_v31, %v4355_v45 }
 0x25d   : > { %v4625_v33 = vsel %vm1780_vm12, %v1703_v51, -1e+30  ;;  %v1706_v39 = vmul.f32 0.17677669, %v1662_v17  ;;  %v1657_v40 = vadd.f32 %v1656_v7, %v1447_v30  ;;  %vm4633_vm8 = vmand %vm5102_vm14, %vm1764_vm1  ;;  %v1731_v29 = vadd.s32 136, %v4353_v44 }
 0x25e   : > { %v3354_v8 = vpop.f32.mrf.mxu1  ;;  %v1457_v5 = vadd.f32 %v4349_v42, %v4281_v58  ;;  %v1472_v25 = vadd.f32 %v4351_v43, %v4301_v6  ;;  %vm5105_vm1 = vmmov %vm5099_vm10  ;;  %v1467_v35 = vadd.f32 %v4357_v46, %v4293_v2  ;;  %v1482_v61 = vadd.f32 %v4359_v47, %v4317_v14 }
 0x25f   : > { %v4645_v18 = vsel %vm4612_vm11, %v1706_v39, -1e+30  ;;  %v1705_v31 = vmul.f32 0.17677669, %v1657_v40  ;;  %v1672_v19 = vadd.f32 %v3354_v8, %v1462_v60  ;;  %v1823_v13 = vsel %vm5105_vm1, %v4623_v62, -inf  ;;  %vm5106_vm3 = vmmov %vm5105_vm1 }
 0x260   : > { %v1821_v24 = vsel %vm5106_vm3, %v4625_v33, -inf  ;;  %vm5107_vm15 = vmmov %vm5105_vm1  ;;  %v1666_v58 = vpop.f32.mrf.mxu1  ;;  %v1824_v2 = vmax.f32 %v1816_v34, %v1823_v13  ;;  %v1477_v63 = vadd.f32 %v4365_v50, %v4309_v10 }
 0x261   : > { %v1827_v26 = vsel %vm5107_vm15, %v4645_v18, -inf  ;;  %vm1785_vm10 = vmand %vm1748_vm13, %vm1767_vm0  ;;  %v4663_v6 = vsel %vm4633_vm8, %v1705_v31, -1e+30  ;;  %v1708_v43 = vmul.f32 0.17677669, %v1672_v19  ;;  %v1667_v27 = vadd.f32 %v1666_v58, %v1457_v5 }
 0x262   : > { %v1828_v42 = vmax.f32 %v1820_v28, %v1827_v26  ;;  %vm4673_vm12 = vmand %vm1747_vm6, %vm1766_vm7  ;;  %v3357_v9 = vpop.f32.mrf.mxu1  ;;  %vm1752_vm13 = vcmp.ge.s32.totalorder %v1731_v29, %v4355_v45  ;;  %vm1771_vm0 = vcmp.lt.s32.totalorder %v1731_v29, %v4363_v49  ;;  %v1730_v28 = vadd.s32 128, %v4353_v44 }
 0x263   : > { %v4683_v46 = vsel %vm1785_vm10, %v1708_v43, -1e+30  ;;  %v1707_v54 = vmul.f32 0.17677669, %v1667_v27  ;;  %v1682_v55 = vadd.f32 %v3357_v9, %v1472_v25  ;;  %v1822_v37 = vmax.f32 %v1814_v36, %v1821_v24  ;;  %vm5110_vm11 = vmmov %vm5105_vm1 }
 0x264   : > { %v1825_v11 = vsel %vm5110_vm11, %v4663_v6, -inf  ;;  %vm5111_vm6 = vmmov %vm5105_vm1  ;;  %v1676_v53 = vpop.f32.mrf.mxu1 }
 0x265   : > { %v1831_v44 = vsel %vm5111_vm6, %v4683_v46, -inf  ;;  %vm1787_vm7 = vmand %vm1750_vm2, %vm1769_vm4  ;;  %v4700_v14 = vsel %vm4673_vm12, %v1707_v54, -1e+30  ;;  %v1710_v47 = vmul.f32 0.17677669, %v1682_v55  ;;  %v1677_v34 = vadd.f32 %v1676_v53, %v1467_v35 }
 0x266   : > { %v1832_v57 = vmax.f32 %v1824_v2, %v1831_v44  ;;  %vm5112_vm14 = vmmov %vm5105_vm1  ;;  %v3360_v36 = vpop.f32.mrf.mxu1  ;;  %vm1751_vm2 = vcmp.ge.s32.totalorder %v1730_v28, %v4355_v45  ;;  %vm1770_vm4 = vcmp.lt.s32.totalorder %v1730_v28, %v4363_v49  ;;  %v1826_v10 = vmax.f32 %v1818_v0, %v1825_v11 }
 0x267   : > { %v1829_v22 = vsel %vm5112_vm14, %v4700_v14, -inf  ;;  %vm1786_vm8 = vmand %vm1749_vm9, %vm1768_vm5  ;;  %v4712_v30 = vsel %vm1787_vm7, %v1710_v47, -1e+30  ;;  %v1709_v51 = vmul.f32 0.17677669, %v1677_v34  ;;  %v1692_v17 = vadd.f32 %v3360_v36, %v1482_v61 }
 0x268   : > { %v1830_v4 = vmax.f32 %v1822_v37, %v1829_v22  ;;  %v1835_v50 = vsel %vm5105_vm1, %v4712_v30, -inf  ;;  %vm1789_vm9 = vmand %vm1752_vm13, %vm1771_vm0  ;;  %v1686_v21 = vpop.f32.mrf.mxu1 }
 0x269   : > { %v1836_v60 = vmax.f32 %v1828_v42, %v1835_v50  ;;  %v4723_v16 = vsel %vm1786_vm8, %v1709_v51, -1e+30  ;;  %v1712_v7 = vmul.f32 0.17677669, %v1692_v17  ;;  %v1687_v39 = vadd.f32 %v1686_v21, %v1477_v63  ;;  %vm5113_vm5 = vmmov %vm5105_vm1 }
 0x26a   : > { %v1833_v40 = vsel %vm5113_vm5, %v4723_v16, -inf  ;;  %vm1788_vm3 = vmand %vm1751_vm2, %vm1770_vm4 }
 0x26b   : > { %v1834_v56 = vmax.f32 %v1826_v10, %v1833_v40  ;;  %v4729_v59 = vsel %vm1789_vm9, %v1712_v7, -1e+30  ;;  %v1711_v0 = vmul.f32 0.17677669, %v1687_v39  ;;  %vm5114_vm15 = vmmov %vm5105_vm1 }
 0x26c   : > { %v1839_v49 = vsel %vm5114_vm15, %v4729_v59, -inf  ;;  %vm5115_vm10 = vmmov %vm5105_vm1 }
 0x26d   : > { %v1842_v20 = vmax.f32 %v1834_v56, %v1836_v60  ;;  %v1840_v8 = vmax.f32 %v1832_v57, %v1839_v49  ;;  %v4733_v29 = vsel %vm1788_vm3, %v1711_v0, -1e+30  ;;  %vm5116_vm12 = vmmov %vm5105_vm1 }
 0x26e   : > { %v1837_v5 = vsel %vm5115_vm10, %v4733_v29, -inf  ;;  %vm5117_vm13 = vmmov %vm5105_vm1 }
 0x26f   : > { %v1838_v31 = vmax.f32 %v1830_v4, %v1837_v5  ;;  %vm5118_vm0 = vmmov %vm5105_vm1 }
 0x270   : > { %vm5119_vm11 = vmmov %vm5118_vm0 }
 0x271   : > { %v1841_v19 = vmax.f32 %v1838_v31, %v1840_v8  ;;  %vm5120_vm6 = vmmov %vm5118_vm0 }
 0x272   : > { %vm5121_vm7 = vmmov %vm5118_vm0 }
 0x273   : > { %v1843_v25 = vmax.f32 %v1841_v19, %v1842_v20  ;;  %vm5122_vm14 = vmmov %vm5118_vm0 }
 0x274   : > { %vm5123_vm8 = vmmov %vm5118_vm0 }
 0x275   : > { %v1844_v13 = vrot.slane %v1843_v25, 4  ;;  %vm5124_vm2 = vmmov %vm5118_vm0 }
 0x276   : > { %vm5125_vm4 = vmmov %vm5118_vm0 }
 0x277   : > { %v1845_v45 = vmax.f32 %v1843_v25, %v1844_v13  ;;  %vm5126_vm1 = vmmov %vm5118_vm0 }
 0x278   : > { %vm5127_vm9 = vmmov %vm5118_vm0 }
 0x279   : > { %v1846_v24 = vrot.slane %v1845_v45, 2  ;;  %vm5128_vm5 = vmmov %vm5118_vm0 }
 0x27a   : > { %vm5129_vm3 = vmmov %vm5118_vm0 }
 0x27b   : > { %v1847_v26 = vmax.f32 %v1845_v45, %v1846_v24  ;;  %vm5130_vm15 = vmmov %vm5118_vm0 }
 0x27c   : > { %vm5131_vm10 = vmmov %vm5118_vm0 }
 0x27d   : > { %v1848_v58 = vrot.slane %v1847_v26, 1 }
 0x27f   : > { %v4737_v42 = vmax.f32 %v1847_v26, %v1848_v58 }
 0x281   : > { %v1866_v43 = vsub.f32 %v4733_v29, %v4737_v42  ;;  %v1850_v27 = vsub.f32 %v4492_v3, %v4737_v42  ;;  %v1851_v35 = vsub.f32 %v4463_v48, %v4737_v42  ;;  %v1852_v38 = vsub.f32 %v4548_v1, %v4737_v42 }
 0x282   : > { %v1853_v9 = vsub.f32 %v4520_v12, %v4737_v42  ;;  %v1854_v28 = vsub.f32 %v4536_v15, %v4737_v42  ;;  %v1855_v2 = vsub.f32 %v4506_v32, %v4737_v42  ;;  %v1856_v54 = vsub.f32 %v4571_v41, %v4737_v42 }
 0x283   : > { %v1857_v3 = vsub.f32 %v4562_v23, %v4737_v42  ;;  %v1861_v48 = vsub.f32 %v4645_v18, %v4737_v42  ;;  %v1862_v1 = vsub.f32 %v4700_v14, %v4737_v42  ;;  %v1863_v12 = vsub.f32 %v4683_v46, %v4737_v42 }
 0x284   : > { %v1864_v15 = vsub.f32 %v4723_v16, %v4737_v42  ;;  %v1865_v32 = vsub.f32 %v4712_v30, %v4737_v42  ;;  %v1867_v41 = vsub.f32 %v4729_v59, %v4737_v42  ;;  %v1868_v55 = vmul.f32 1.442695, %v1850_v27 }
 0x285   : > { %v1870_v23 = vmul.f32 1.442695, %v1851_v35  ;;  %v1872_v61 = vmul.f32 1.442695, %v1852_v38  ;;  %v1874_v37 = vmul.f32 1.442695, %v1853_v9  ;;  %v1858_v46 = vsub.f32 %v4625_v33, %v4737_v42 }
 0x286   : > { %3544 = vpow2.f32 %v1868_v55  ;;  %v1876_v18 = vmul.f32 1.442695, %v1854_v28  ;;  %v1878_v11 = vmul.f32 1.442695, %v1855_v2  ;;  %v1880_v44 = vmul.f32 1.442695, %v1856_v54 }
 0x287   : > { %3546 = vpow2.f32 %v1870_v23  ;;  %v1859_v53 = vsub.f32 %v4623_v62, %v4737_v42  ;;  %v1882_v57 = vmul.f32 1.442695, %v1857_v3  ;;  %v1860_v14 = vsub.f32 %v4663_v6, %v4737_v42 }
 0x288   : > { %3548 = vpow2.f32 %v1872_v61  ;;  %v1884_v47 = vmul.f32 1.442695, %v1858_v46  ;;  %v1890_v62 = vmul.f32 1.442695, %v1861_v48  ;;  %v1892_v17 = vmul.f32 1.442695, %v1862_v1 }
 0x289   : > { %3550 = vpow2.f32 %v1874_v37  ;;  %v1886_v34 = vmul.f32 1.442695, %v1859_v53  ;;  %v1888_v22 = vmul.f32 1.442695, %v1860_v14  ;;  %v1894_v60 = vmul.f32 1.442695, %v1863_v12 }
 0x28a   : > { %3552 = vpow2.f32 %v1876_v18  ;;  %v1896_v40 = vmul.f32 1.442695, %v1864_v15  ;;  %v1898_v49 = vmul.f32 1.442695, %v1865_v32  ;;  %v1900_v31 = vmul.f32 1.442695, %v1866_v43 }
 0x28b   : > { %3554 = vpow2.f32 %v1878_v11  ;;  %v1902_v45 = vmul.f32 1.442695, %v1867_v41 }
 0x28c   : > { %3556 = vpow2.f32 %v1880_v44 }
 0x28d   : > { %3558 = vpow2.f32 %v1882_v57 }
 0x28e   : > { %3560 = vpow2.f32 %v1884_v47 }
 0x28f   : > { %3562 = vpow2.f32 %v1886_v34 }
 0x290   : > { %3564 = vpow2.f32 %v1888_v22 }
 0x291   : > { %3566 = vpow2.f32 %v1890_v62 }
 0x292   : > { %3568 = vpow2.f32 %v1892_v17 }
 0x293   : > { %v4775_v63 = vpop.eup %3544  ;;  %3570 = vpow2.f32 %v1894_v60 }
 0x294   : > { %v4777_v36 = vpop.eup %3546  ;;  %v1904_v33 = vsel %vm5116_vm12, %v4775_v63, 0.0  ;;  %3572 = vpow2.f32 %v1896_v40  ;;  %vm5132_vm12 = vmmov %vm5118_vm0 }
 0x295   : > { %v4781_v4 = vpop.eup %3548  ;;  %v1905_v6 = vsel %vm5117_vm13, %v4777_v36, 0.0  ;;  %3574 = vpow2.f32 %v1898_v49  ;;  %vm5133_vm13 = vmmov %vm5118_vm0 }
 0x296   : > { %v4785_v30 = vpop.eup %3550  ;;  %v1906_v51 = vadd.f32 %v1905_v6, %v1904_v33  ;;  %v1907_v10 = vsel %vm5118_vm0, %v4781_v4, 0.0  ;;  %3576 = vpow2.f32 %v1900_v31 }
 0x297   : > { %v4789_v50 = vpop.eup %3552  ;;  %v1909_v16 = vsel %vm5119_vm11, %v4785_v30, 0.0  ;;  %3578 = vpow2.f32 %v1902_v45  ;;  %vm5134_vm11 = vmmov %vm5118_vm0 }
 0x298   : > { %v1908_v21 = vadd.f32 %v1907_v10, %v1906_v51  ;;  %v4793_v7 = vpop.eup %3554  ;;  %v1911_v56 = vsel %vm5120_vm6, %v4789_v50, 0.0  ;;  %vm5135_vm6 = vmmov %vm5118_vm0 }
 0x299   : > { %v4797_v59 = vpop.eup %3556  ;;  %v1913_v20 = vsel %vm5121_vm7, %v4793_v7, 0.0  ;;  %vm5136_vm7 = vmmov %vm5118_vm0 }
 0x29a   : > { %v1910_v39 = vadd.f32 %v1909_v16, %v1908_v21  ;;  %v3559_v8 = vpop.eup %3558  ;;  %v1915_v19 = vsel %vm5122_vm14, %v4797_v59, 0.0  ;;  %vm5137_vm14 = vmmov %vm5118_vm0 }
 0x29b   : > { %v3561_v25 = vpop.eup %3560  ;;  %v1917_v24 = vsel %vm5123_vm8, %v3559_v8, 0.0  ;;  %vm5138_vm8 = vmmov %vm5118_vm0 }
 0x29c   : > { %v1912_v0 = vadd.f32 %v1911_v56, %v1910_v39  ;;  %v3563_v26 = vpop.eup %3562  ;;  %v1919_v27 = vsel %vm5124_vm2, %v3561_v25, 0.0  ;;  %vm5139_vm2 = vmmov %vm5118_vm0 }
 0x29d   : > { %v3565_v35 = vpop.eup %3564  ;;  %v1921_v29 = vsel %vm5125_vm4, %v3563_v26, 0.0  ;;  %vm5140_vm4 = vmmov %vm5118_vm0 }
 0x29e   : > { %v1914_v5 = vadd.f32 %v1913_v20, %v1912_v0  ;;  %v3567_v42 = vpop.eup %3566  ;;  %v1923_v9 = vsel %vm5126_vm1, %v3565_v35, 0.0  ;;  %vm5141_vm1 = vmmov %vm5118_vm0 }
 0x29f   : > { %v3569_v28 = vpop.eup %3568  ;;  %v1925_v54 = vsel %vm5127_vm9, %v3567_v42, 0.0  ;;  %vm5142_vm9 = vmmov %vm5118_vm0 }
 0x2a0   : > { %v1916_v13 = vadd.f32 %v1915_v19, %v1914_v5  ;;  %v3571_v3 = vpop.eup %3570  ;;  %v1927_v1 = vsel %vm5128_vm5, %v3569_v28, 0.0  ;;  %vm5143_vm5 = vmmov %vm5118_vm0 }
 0x2a1   : > { %v3573_v12 = vpop.eup %3572  ;;  %v1929_v32 = vsel %vm5129_vm3, %v3571_v3, 0.0  ;;  %vm5144_vm3 = vmmov %vm5118_vm0 }
 0x2a2   : > { %v1918_v58 = vadd.f32 %v1917_v24, %v1916_v13  ;;  %v3575_v41 = vpop.eup %3574  ;;  %v1931_v23 = vsel %vm5130_vm15, %v3573_v12, 0.0  ;;  %vm5145_vm15 = vmmov %vm5118_vm0 }
 0x2a3   : > { %v3577_v61 = vpop.eup %3576  ;;  %v1933_v18 = vsel %vm5131_vm10, %v3575_v41, 0.0  ;;  %vm5146_vm10 = vmmov %vm5118_vm0 }
 0x2a4   : > { %v1920_v38 = vadd.f32 %v1919_v27, %v1918_v58  ;;  %v3579_v11 = vpop.eup %3578  ;;  %v1935_v44 = vsel %vm5132_vm12, %v3577_v61, 0.0  ;;  %vm5147_vm12 = vmmov %vm5118_vm0 }
 0x2a5   : > { %v1937_v57 = vsel %vm5133_vm13, %v3579_v11, 0.0  ;;  %vm5148_vm13 = vmmov %vm5118_vm0 }
 0x2a6   : > { %v1922_v43 = vadd.f32 %v1921_v29, %v1920_v38 }
 0x2a8   : > { %v1924_v2 = vadd.f32 %v1923_v9, %v1922_v43 }
 0x2aa   : > { %v1926_v48 = vadd.f32 %v1925_v54, %v1924_v2 }
 0x2ac   : > { %v1928_v15 = vadd.f32 %v1927_v1, %v1926_v48  ;;  %v2263_v48 = vld [vmem:[%s5071_s8 + $0x48] sm:$0xff]  ;;  %v2262_v1 = vld [vmem:[%s5071_s8 + $0x40] sm:$0xff] }
 0x2ae   : > { %v1930_v55 = vadd.f32 %v1929_v32, %v1928_v15  ;;  %v2260_v15 = vld [vmem:[%s5071_s8 + $0x30] sm:$0xff]  ;;  %v2259_v32 = vld [vmem:[%s5071_s8 + $0x28] sm:$0xff] }
 0x2b0   : > { %v1932_v37 = vadd.f32 %v1931_v23, %v1930_v55  ;;  %v535_v55 = vld [vmem:[%s4870_s22] sm:$0xff]  ;;  %v2219_v23 = vld [vmem:[#allocation2 + $0x8] sm:$0xff] }
 0x2b2   : > { %v1934_v46 = vadd.f32 %v1933_v18, %v1932_v37  ;;  %v2256_v37 = vld [vmem:[%s5071_s8 + $0x10] sm:$0xff]  ;;  %v2255_v18 = vld [vmem:[%s5071_s8 + $0x8] sm:$0xff] }
 0x2b4   : > { %v1936_v53 = vadd.f32 %v1935_v44, %v1934_v46  ;;  %v536_v46 = vld [vmem:[%s4870_s22 + $0x8] sm:$0xff]  ;;  %v537_v44 = vld [vmem:[%s4870_s22 + $0x10] sm:$0xff] }
 0x2b6   : > { %v1938_v14 = vadd.f32 %v1937_v57, %v1936_v53  ;;  %v538_v53 = vld [vmem:[%s4870_s22 + $0x18] sm:$0xff]  ;;  %v539_v57 = vld [vmem:[%s4870_s22 + $0x20] sm:$0xff] }
 0x2b8   : > { %v1939_v47 = vrot.slane %v1938_v14, 4 }
 0x2ba   : > { %v1940_v34 = vadd.f32 %v1939_v47, %v1938_v14  ;;  %v540_v14 = vld [vmem:[%s4870_s22 + $0x28] sm:$0xff]  ;;  %v541_v47 = vld [vmem:[%s4870_s22 + $0x30] sm:$0xff] }
 0x2bc   : > { %v1941_v22 = vrot.slane %v1940_v34, 2 }
 0x2be   : > { %v1942_v33 = vadd.f32 %v1941_v22, %v1940_v34  ;;  %v542_v34 = vld [vmem:[%s4870_s22 + $0x38] sm:$0xff]  ;;  %v543_v22 = vld [vmem:[%s4870_s22 + $0x40] sm:$0xff] }
 0x2c0   : > { %v1943_v62 = vrot.slane %v1942_v33, 1 }
 0x2c2   : > { %v1944_v6 = vadd.f32 %v1943_v62, %v1942_v33  ;;  %v544_v33 = vld [vmem:[%s4870_s22 + $0x48] sm:$0xff]  ;;  %v4907_v62 = vpop.f32.mrf.mxu0 }
 0x2c4   : > { %3580 = vrcp.f32 %v1944_v6  ;;  %v4910_v6 = vpop.f32.mrf.mxu0 }
 0x2d1   : > { %v3581_v51 = vpop.eup %3580 }
 0x2d2   : > { %v1961_v17 = vmul.f32 %v3581_v51, %v3575_v41  ;;  %v1959_v10 = vmul.f32 %v3581_v51, %v3571_v3  ;;  %v1960_v21 = vmul.f32 %v3581_v51, %v3573_v12  ;;  %v1958_v60 = vmul.f32 %v3581_v51, %v3569_v28  ;;  %v2264_v3 = vld [vmem:[%s5071_s8 + $0x50] sm:$0xff]  ;;  %v2261_v12 = vld [vmem:[%s5071_s8 + $0x38] sm:$0xff]  ;;  %v2258_v41 = vld [vmem:[%s5071_s8 + $0x20] sm:$0xff] }
 0x2d3   : > { %v1957_v16 = vmul.f32 %v3581_v51, %v3567_v42  ;;  %v1956_v39 = vmul.f32 %v3581_v51, %v3565_v35  ;;  %v1955_v40 = vmul.f32 %v3581_v51, %v3563_v26  ;;  %v1954_v56 = vmul.f32 %v3581_v51, %v3561_v25 }
 0x2d4   : > { %v2009_v0 = vsel %vm5118_vm0, %v1961_v17, 0.0  ;;  %v2003_v49 = vsel %vm5134_vm11, %v1959_v10, 0.0  ;;  %v1953_v20 = vmul.f32 %v3581_v51, %v3559_v8  ;;  %v1952_v5 = vmul.f32 %v3581_v51, %v4797_v59  ;;  %vm5149_vm11 = vmmov %vm5118_vm0  ;;  %v546_v17 = vld [vmem:[%s4870_s22 + $0x58] sm:$0xff]  ;;  %v4915_v10 = vpop.f32.mrf.mxu0 }
 0x2d5   : > { %2010 = vadd.xlane.f32.xlu0 %v2009_v0  ;;  %2004 = vadd.xlane.f32.xlu1 %v2003_v49  ;;  %v1951_v31 = vmul.f32 %v3581_v51, %v4793_v7  ;;  %v1950_v19 = vmul.f32 %v3581_v51, %v4789_v50  ;;  %v1949_v13 = vmul.f32 %v3581_v51, %v4785_v30  ;;  %v2006_v45 = vsel %vm5135_vm6, %v1960_v21, 0.0  ;;  %v550_v0 = vld [vmem:[%s4870_s22 + $0x78] sm:$0xff] }
 0x2d6   : > { %v2000_v24 = vsel %vm5136_vm7, %v1958_v60, 0.0  ;;  %v1963_v25 = vmul.f32 %v3581_v51, %v3579_v11  ;;  %v1962_v26 = vmul.f32 %v3581_v51, %v3577_v61  ;;  %v1997_v58 = vsel %vm5137_vm14, %v1957_v16, 0.0  ;;  %v2257_v61 = vld [vmem:[%s5071_s8 + $0x18] sm:$0xff]  ;;  %v2254_v11 = vld [vmem:[%s5071_s8] sm:$0xff]  ;;  %v4918_v21 = vpop.f32.mrf.mxu0  ;;  %v548_v16 = vld [vmem:[%s4870_s22 + $0x68] sm:$0xff] }
 0x2d7   : > { %v1994_v8 = vsel %vm5138_vm8, %v1956_v39, 0.0  ;;  %v1991_v7 = vsel %vm5139_vm2, %v1955_v40, 0.0  ;;  %v1988_v50 = vsel %vm5140_vm4, %v1954_v56, 0.0  ;;  %v1985_v30 = vsel %vm5141_vm1, %v1953_v20, 0.0  ;;  %v547_v60 = vld [vmem:[%s4870_s22 + $0x60] sm:$0xff]  ;;  %v549_v56 = vld [vmem:[%s4870_s22 + $0x70] sm:$0xff] }
 0x2d8   : > { %v1982_v59 = vsel %vm5142_vm9, %v1952_v5, 0.0  ;;  %v1979_v27 = vsel %vm5143_vm5, %v1951_v31, 0.0  ;;  %v1976_v35 = vsel %vm5144_vm3, %v1950_v19, 0.0  ;;  %v1948_v38 = vmul.f32 %v3581_v51, %v4781_v4  ;;  %v4923_v39 = vpop.f32.mrf.mxu0  ;;  %v551_v5 = vld [vmem:[%s4870_s22 + $0x80] sm:$0xff]  ;;  %v552_v31 = vld [vmem:[%s4870_s22 + $0x88] sm:$0xff] }
 0x2d9   : > { %2007 = vadd.xlane.f32.xlu0 %v2006_v45  ;;  %2001 = vadd.xlane.f32.xlu1 %v2000_v24  ;;  %v1973_v29 = vsel %vm5145_vm15, %v1949_v13, 0.0  ;;  %v1947_v43 = vmul.f32 %v3581_v51, %v4777_v36  ;;  %v1946_v9 = vmul.f32 %v3581_v51, %v4775_v63  ;;  %v2015_v4 = vsel %vm5118_vm0, %v1963_v25, 0.0  ;;  %v2266_v36 = vld [vmem:[%s5071_s8 + $0x60] sm:$0x1f]  ;;  %v2265_v63 = vld [vmem:[%s5071_s8 + $0x58] sm:$0xff]  ;;  %v545_v51 = vld [vmem:[%s4870_s22 + $0x50] sm:$0xff] }
 0x2da   : > { %v1970_v42 = vsel %vm5146_vm10, %v1948_v38, 0.0  ;;  %v2012_v54 = vsel %vm5149_vm11, %v1962_v26, 0.0  ;;  %vm2322_vm6 = vcmask 1044480   ;;  %vm2267_vm7 = vcmask 826368   ;;  %v4926_v40 = vpop.f32.mrf.mxu0 }
 0x2db   : > { %v1967_v28 = vsel %vm5147_vm12, %v1947_v43, 0.0  ;;  %v1964_v2 = vsel %vm5148_vm13, %v1946_v9, 0.0  ;;  %3404 = vmatprep.subr.msk.mxu1 %vm2322_vm6, %v2266_v36  ;;  %vm2481_vm14 = vcmask 130048   ;;  %3430 = vmatprep.mubr.msk.f32.mxu1 %vm2267_vm7, %v535_v55  ;;  %vm2018_vm8 = vcmask 7168  }
 0x2dc   : > { %3405 = vmatpush3.msk.msra.mxu1 %vm2322_vm6, %v2266_v36  ;;  %3001 = vmatprep.mubr.msk.f32.mxu0 %vm2481_vm14, %v2219_v23  ;;  %v3388_v49 = vpop.f32.mrf.mxu0  ;;  %vm5150_vm2 = vcmask 261120  }
 0x2dd   : > { %1998 = vadd.xlane.f32.xlu0 %v1997_v58  ;;  %1995 = vadd.xlane.f32.xlu1 %v1994_v8  ;;  %vm5151_vm4 = vmmov %vm5150_vm2 }
 0x2de   : > { %3406 = vmatprep.subr.mxu1 %v2265_v63  ;;  %v2141_v20 = vpop.f32.mrf.mxu0  ;;  %vm5152_vm1 = vmmov %vm5150_vm2 }
 0x2df   : > { %3407 = vmatpush3.msra.mxu1 %v2265_v63  ;;  %vm5153_vm9 = vmmov %vm5152_vm1 }
 0x2e0   : > { %3408 = vmatprep.subr.mxu1 %v2264_v3  ;;  %v3391_v19 = vpop.f32.mrf.mxu0  ;;  %vm5154_vm5 = vmmov %vm5152_vm1 }
 0x2e1   : > { %1992 = vadd.xlane.f32.xlu0 %v1991_v7  ;;  %1989 = vadd.xlane.f32.xlu1 %v1988_v50  ;;  %vm5155_vm3 = vmmov %vm5152_vm1 }
 0x2e2   : > { %3409 = vmatpush3.msra.mxu1 %v2264_v3  ;;  %v2151_v13 = vpop.f32.mrf.mxu0  ;;  %vm5156_vm15 = vmmov %vm5152_vm1 }
 0x2e3   : > { %3410 = vmatprep.subr.mxu1 %v2263_v48  ;;  %vm5157_vm10 = vmmov %vm5152_vm1 }
 0x2e4   : > { %3411 = vmatpush3.msra.mxu1 %v2263_v48  ;;  %v3394_v45 = vpop.f32.mrf.mxu0  ;;  %vm5158_vm12 = vmmov %vm5152_vm1 }
 0x2e5   : > { %1986 = vadd.xlane.f32.xlu0 %v1985_v30  ;;  %1983 = vadd.xlane.f32.xlu1 %v1982_v59  ;;  %vm5159_vm13 = vmmov %vm5152_vm1 }
 0x2e6   : > { %3412 = vmatprep.subr.mxu1 %v2262_v1  ;;  %v2161_v24 = vpop.f32.mrf.mxu0  ;;  %vm5160_vm0 = vmmov %vm5152_vm1 }
 0x2e7   : > { %3413 = vmatpush3.msra.mxu1 %v2262_v1  ;;  %vm5161_vm11 = vmmov %vm5160_vm0 }
 0x2e8   : > { %3414 = vmatprep.subr.mxu1 %v2261_v12  ;;  %v3397_v25 = vpop.f32.mrf.mxu0  ;;  %vm5162_vm6 = vmmov %vm5160_vm0 }
 0x2e9   : > { %1980 = vadd.xlane.f32.xlu0 %v1979_v27  ;;  %1977 = vadd.xlane.f32.xlu1 %v1976_v35 }
 0x2ea   : > { %3415 = vmatpush3.msra.mxu1 %v2261_v12  ;;  %v2171_v26 = vpop.f32.mrf.mxu0 }
 0x2eb   : > { %3416 = vmatprep.subr.mxu1 %v2260_v15 }
 0x2ec   : > { %3417 = vmatpush3.msra.mxu1 %v2260_v15  ;;  %v3400_v58 = vpop.f32.mrf.mxu0 }
 0x2ed   : > { %1974 = vadd.xlane.f32.xlu0 %v1973_v29  ;;  %1971 = vadd.xlane.f32.xlu1 %v1970_v42 }
 0x2ee   : > { %3418 = vmatprep.subr.mxu1 %v2259_v32  ;;  %v2181_v30 = vpop.f32.mrf.mxu0 }
 0x2ef   : > { %3419 = vmatpush3.msra.mxu1 %v2259_v32 }
 0x2f0   : > { %3420 = vmatprep.subr.mxu1 %v2258_v41 }
 0x2f1   : > { %1968 = vadd.xlane.f32.xlu0 %v1967_v28  ;;  %1965 = vadd.xlane.f32.xlu1 %v1964_v2 }
 0x2f2   : > { %3421 = vmatpush3.msra.mxu1 %v2258_v41 }
 0x2f3   : > { %3422 = vmatprep.subr.mxu1 %v2257_v61 }
 0x2f4   : > { %3423 = vmatpush3.msra.mxu1 %v2257_v61 }
 0x2f5   : > { %2016 = vadd.xlane.f32.xlu0 %v2015_v4  ;;  %2013 = vadd.xlane.f32.xlu1 %v2012_v54 }
 0x2f6   : > { %3424 = vmatprep.subr.mxu1 %v2256_v37 }
 0x2f7   : > { %3425 = vmatpush3.msra.mxu1 %v2256_v37 }
 0x2f8   : > { %3426 = vmatprep.subr.mxu1 %v2255_v18 }
 0x2f9   : > { %3427 = vmatpush3.msra.mxu1 %v2255_v18 }
 0x2fa   : > { %3428 = vmatprep.subr.mxu1 %v2254_v11 }
 0x2fb   : > { %3429 = vmatpush3.msra.mxu1 %v2254_v11 }
 0x2fc   : > { %3431 = vmatmul.mubr.msk.f32.vlgmr.msra.gmra.mxu1 %vm2267_vm7, %v536_v46  ;;  %v3403_v46 = vpop.f32.mrf.mxu0 }
 0x2fd   : > { %3433 = vmatprep.mubr.msk.f32.mxu1 %vm2267_vm7, %v537_v44 }
 0x300   : > { %3434 = vmatmul.mubr.msk.f32.gmra.mxu1 %vm2267_vm7, %v538_v53 }
 0x301   : > { %3436 = vmatprep.mubr.msk.f32.mxu1 %vm2267_vm7, %v539_v57 }
 0x304   : > { %3437 = vmatmul.mubr.msk.f32.gmra.mxu1 %vm2267_vm7, %v540_v14 }
 0x305   : > { %3439 = vmatprep.mubr.msk.f32.mxu1 %vm2267_vm7, %v541_v47  ;;  %v2191_v47 = vpop.f32.mrf.mxu0 }
 0x308   : > { %3440 = vmatmul.mubr.msk.f32.gmra.mxu1 %vm2267_vm7, %v542_v34 }
 0x309   : > { %3442 = vmatprep.mubr.msk.f32.mxu1 %vm2267_vm7, %v543_v22 }
 0x30c   : > { %3443 = vmatmul.mubr.msk.f32.gmra.mxu1 %vm2267_vm7, %v544_v33  ;;  %v2218_v33 = vld [vmem:[#allocation2] sm:$0xff] }
 0x30d   : > { %3445 = vmatprep.mubr.msk.f32.mxu1 %vm2267_vm7, %v545_v51  ;;  %v2223_v51 = vld [vmem:[#allocation2 + $0x28] sm:$0xff] }
 0x310   : > { %3446 = vmatmul.mubr.msk.f32.gmra.mxu1 %vm2267_vm7, %v546_v17  ;;  %v2222_v17 = vld [vmem:[#allocation2 + $0x20] sm:$0xff] }
 0x311   : > { %3448 = vmatprep.mubr.msk.f32.mxu1 %vm2267_vm7, %v547_v60  ;;  %v2227_v60 = vld [vmem:[#allocation2 + $0x48] sm:$0xff] }
 0x314   : > { %3449 = vmatmul.mubr.msk.f32.gmra.mxu1 %vm2267_vm7, %v548_v16  ;;  %v2229_v16 = vld [vmem:[#allocation2 + $0x58] sm:$0xff] }
 0x315   : > { %3451 = vmatprep.mubr.msk.f32.mxu1 %vm2267_vm7, %v549_v56  ;;  %v2230_v56 = vld [vmem:[#allocation2 + $0x60] sm:$0xff] }
 0x318   : > { %3452 = vmatmul.mubr.msk.f32.gmra.mxu1 %vm2267_vm7, %v550_v0  ;;  %v2233_v0 = vld [vmem:[#allocation2 + $0x78] sm:$0xff] }
 0x319   : > { %3454 = vmatprep.mubr.msk.f32.mxu1 %vm2267_vm7, %v551_v5  ;;  %v2234_v5 = vld [vmem:[#allocation2 + $0x80] sm:$0xff] }
 0x31c   : > { %3455 = vmatmul.mubr.msk.f32.gmra.mxu1 %vm2267_vm7, %v552_v31  ;;  %v2237_v31 = vld [vmem:[#allocation2 + $0x98] sm:$0xff]  ;;  %vm5163_vm7 = vmmov %vm5160_vm0 }
 0x35e   : > { %v2011_v8 = vpop.xlane.xlu0 %2010  ;;  %v2005_v7 = vpop.xlane.xlu1 %2004 }
 0x35f   : > { %2034 = vst.msk [vmem:[%s4940_s17 + $0x78] sm:$0xff] %vm2018_vm8, %v2011_v8  ;;  %2032 = vst.msk [vmem:[%s4940_s17 + $0x68] sm:$0xff] %vm2018_vm8, %v2005_v7  ;;  %v2215_v50 = vmul.f32 %v3400_v58, %v2011_v8  ;;  %v2213_v38 = vmul.f32 %v3397_v25, %v2005_v7  ;;  %v2240_v25 = vld [vmem:[#allocation2 + $0xb0] sm:$0xff]  ;;  %v2242_v58 = vld [vmem:[#allocation2 + $0xc0] sm:$0xff] }
 0x360   : > { %v2245_v8 = vld [vmem:[#allocation2 + $0xd8] sm:$0xff]  ;;  %v2244_v7 = vld [vmem:[#allocation2 + $0xd0] sm:$0xff] }
 0x361   : > { %2537 = vmatpush1.msra.mxu0 %v2215_v50  ;;  %v2247_v50 = vld [vmem:[#allocation2 + $0xe8] sm:$0xff] }
 0x362   : > { %v2008_v59 = vpop.xlane.xlu0 %2007  ;;  %v2002_v27 = vpop.xlane.xlu1 %2001  ;;  %2538 = vmatprep.subr.mxu0 %v3659_v52 }
 0x363   : > { %2033 = vst.msk [vmem:[%s4940_s17 + $0x70] sm:$0xff] %vm2018_vm8, %v2008_v59  ;;  %2031 = vst.msk [vmem:[%s4940_s17 + $0x60] sm:$0xff] %vm2018_vm8, %v2002_v27  ;;  %v2214_v35 = vmul.f32 %v2181_v30, %v2008_v59  ;;  %v2212_v43 = vmul.f32 %v2171_v26, %v2002_v27  ;;  %v2243_v26 = vld [vmem:[#allocation2 + $0xc8] sm:$0xff]  ;;  %v2246_v30 = vld [vmem:[#allocation2 + $0xe0] sm:$0xff] }
 0x364   : > { %v2249_v59 = vld [vmem:[#allocation2 + $0xf8] sm:$0xff]  ;;  %v2248_v27 = vld [vmem:[#allocation2 + $0xf0] sm:$0xff] }
 0x365   : > { %2539 = vmatpush1.msra.mxu0 %v2214_v35  ;;  %v2251_v35 = vld [vmem:[#allocation2 + $0x108] sm:$0xff] }
 0x366   : > { %v1999_v29 = vpop.xlane.xlu0 %1998  ;;  %v1996_v42 = vpop.xlane.xlu1 %1995  ;;  %2540 = vmatprep.subr.mxu0 %v3659_v52 }
 0x367   : > { %2030 = vst.msk [vmem:[%s4940_s17 + $0x58] sm:$0xff] %vm2018_vm8, %v1999_v29  ;;  %2029 = vst.msk [vmem:[%s4940_s17 + $0x50] sm:$0xff] %vm2018_vm8, %v1996_v42  ;;  %2541 = vmatpush1.msra.mxu0 %v2213_v38  ;;  %v2211_v9 = vmul.f32 %v3394_v45, %v1999_v29  ;;  %v2210_v4 = vmul.f32 %v2161_v24, %v1996_v42  ;;  %v2238_v45 = vld [vmem:[#allocation2 + $0xa0] sm:$0xff]  ;;  %v2241_v24 = vld [vmem:[#allocation2 + $0xb8] sm:$0xff] }
 0x368   : > { %2542 = vmatprep.subr.mxu0 %v3659_v52  ;;  %v2250_v38 = vld [vmem:[#allocation2 + $0x100] sm:$0xff]  ;;  %v2253_v29 = vld [vmem:[#allocation2 + $0x118] sm:$0xff]  ;;  %v2252_v42 = vld [vmem:[#allocation2 + $0x110] sm:$0xff] }
 0x369   : > { %2543 = vmatpush1.msra.mxu0 %v2212_v43 }
 0x36a   : > { %v1993_v28 = vpop.xlane.xlu0 %1992  ;;  %v1990_v2 = vpop.xlane.xlu1 %1989  ;;  %2544 = vmatprep.subr.mxu0 %v3659_v52 }
 0x36b   : > { %2028 = vst.msk [vmem:[%s4940_s17 + $0x48] sm:$0xff] %vm2018_vm8, %v1993_v28  ;;  %2027 = vst.msk [vmem:[%s4940_s17 + $0x40] sm:$0xff] %vm2018_vm8, %v1990_v2  ;;  %2545 = vmatpush1.msra.mxu0 %v2211_v9  ;;  %v2209_v54 = vmul.f32 %v3391_v19, %v1993_v28  ;;  %v2208_v3 = vmul.f32 %v2151_v13, %v1990_v2  ;;  %v2236_v19 = vld [vmem:[#allocation2 + $0x90] sm:$0xff]  ;;  %v2239_v13 = vld [vmem:[#allocation2 + $0xa8] sm:$0xff] }
 0x36c   : > { %2546 = vmatprep.subr.mxu0 %v3659_v52 }
 0x36d   : > { %2547 = vmatpush1.msra.mxu0 %v2210_v4 }
 0x36e   : > { %v1987_v36 = vpop.xlane.xlu0 %1986  ;;  %v1984_v63 = vpop.xlane.xlu1 %1983  ;;  %2548 = vmatprep.subr.mxu0 %v3659_v52 }
 0x36f   : > { %2026 = vst.msk [vmem:[%s4940_s17 + $0x38] sm:$0xff] %vm2018_vm8, %v1987_v36  ;;  %2025 = vst.msk [vmem:[%s4940_s17 + $0x30] sm:$0xff] %vm2018_vm8, %v1984_v63  ;;  %2549 = vmatpush1.msra.mxu0 %v2209_v54  ;;  %v2207_v48 = vmul.f32 %v3388_v49, %v1987_v36  ;;  %v2206_v15 = vmul.f32 %v2141_v20, %v1984_v63  ;;  %v2232_v49 = vld [vmem:[#allocation2 + $0x70] sm:$0xff]  ;;  %v2235_v20 = vld [vmem:[#allocation2 + $0x88] sm:$0xff] }
 0x370   : > { %2550 = vmatprep.subr.mxu0 %v3659_v52 }
 0x371   : > { %2551 = vmatpush1.msra.mxu0 %v2208_v3 }
 0x372   : > { %v1981_v1 = vpop.xlane.xlu0 %1980  ;;  %v1978_v12 = vpop.xlane.xlu1 %1977  ;;  %2552 = vmatprep.subr.mxu0 %v3659_v52 }
 0x373   : > { %2024 = vst.msk [vmem:[%s4940_s17 + $0x28] sm:$0xff] %vm2018_vm8, %v1981_v1  ;;  %2023 = vst.msk [vmem:[%s4940_s17 + $0x20] sm:$0xff] %vm2018_vm8, %v1978_v12  ;;  %2553 = vmatpush1.msra.mxu0 %v2207_v48  ;;  %v2205_v32 = vmul.f32 %v4923_v39, %v1981_v1  ;;  %v2204_v23 = vmul.f32 %v4926_v40, %v1978_v12  ;;  %v2228_v39 = vld [vmem:[#allocation2 + $0x50] sm:$0xff]  ;;  %v2231_v40 = vld [vmem:[#allocation2 + $0x68] sm:$0xff] }
 0x374   : > { %2554 = vmatprep.subr.mxu0 %v3659_v52 }
 0x375   : > { %2555 = vmatpush1.msra.mxu0 %v2206_v15 }
 0x376   : > { %v1975_v41 = vpop.xlane.xlu0 %1974  ;;  %v1972_v55 = vpop.xlane.xlu1 %1971  ;;  %2556 = vmatprep.subr.mxu0 %v3659_v52 }
 0x377   : > { %2022 = vst.msk [vmem:[%s4940_s17 + $0x18] sm:$0xff] %vm2018_vm8, %v1975_v41  ;;  %2021 = vst.msk [vmem:[%s4940_s17 + $0x10] sm:$0xff] %vm2018_vm8, %v1972_v55  ;;  %2557 = vmatpush1.msra.mxu0 %v2205_v32  ;;  %v2203_v61 = vmul.f32 %v4915_v10, %v1975_v41  ;;  %v2202_v11 = vmul.f32 %v4918_v21, %v1972_v55  ;;  %v2225_v10 = vld [vmem:[#allocation2 + $0x38] sm:$0xff]  ;;  %v2224_v21 = vld [vmem:[#allocation2 + $0x30] sm:$0xff] }
 0x378   : > { %2558 = vmatprep.subr.mxu0 %v3659_v52 }
 0x379   : > { %2559 = vmatpush1.msra.mxu0 %v2204_v23 }
 0x37a   : > { %v1969_v37 = vpop.xlane.xlu0 %1968  ;;  %v1966_v18 = vpop.xlane.xlu1 %1965  ;;  %2560 = vmatprep.subr.mxu0 %v3659_v52 }
 0x37b   : > { %2020 = vst.msk [vmem:[%s4940_s17 + $0x8] sm:$0xff] %vm2018_vm8, %v1969_v37  ;;  %2019 = vst.msk [vmem:[%s4940_s17] sm:$0xff] %vm2018_vm8, %v1966_v18  ;;  %2561 = vmatpush1.msra.mxu0 %v2203_v61  ;;  %v2201_v44 = vmul.f32 %v4907_v62, %v1969_v37  ;;  %v2200_v14 = vmul.f32 %v4910_v6, %v1966_v18  ;;  %v2221_v62 = vld [vmem:[#allocation2 + $0x18] sm:$0xff]  ;;  %v2220_v6 = vld [vmem:[#allocation2 + $0x10] sm:$0xff] }
 0x37c   : > { %2562 = vmatprep.subr.mxu0 %v3659_v52 }
 0x37d   : > { %2563 = vmatpush1.msra.mxu0 %v2202_v11 }
 0x37e   : > { %v2017_v53 = vpop.xlane.xlu0 %2016  ;;  %v2014_v57 = vpop.xlane.xlu1 %2013  ;;  %2564 = vmatprep.subr.mxu0 %v3659_v52 }
 0x37f   : > { %2036 = vst.msk [vmem:[%s4940_s17 + $0x88] sm:$0xff] %vm2018_vm8, %v2017_v53  ;;  %2035 = vst.msk [vmem:[%s4940_s17 + $0x80] sm:$0xff] %vm2018_vm8, %v2014_v57  ;;  %2565 = vmatpush1.msra.mxu0 %v2201_v44  ;;  %v2217_v34 = vmul.f32 %v3403_v46, %v2017_v53  ;;  %v2216_v22 = vmul.f32 %v2191_v47, %v2014_v57 }
 0x380   : > { %2566 = vmatprep.subr.mxu0 %v3659_v52  ;;  %vm5165_vm8 = vmmov %vm5160_vm0 }
 0x381   : > { %2567 = vmatpush1.msra.mxu0 %v2200_v14 }
 0x382   : > { %2596 = vmatprep.subr.mxu0 %v3659_v52 }
 0x383   : > { %2597 = vmatpush2.msra.mxu0 %v2217_v34 }
 0x384   : > { %2598 = vmatprep.subr.mxu0 %v3659_v52  ;;  %v2226_v52 = vld [vmem:[#allocation2 + $0x40] sm:$0xff] }
 0x385   : > { %2599 = vmatpush2.msra.mxu0 %v2216_v22 }
 0x386   : > { %2601 = vmatmul.mubr.f32.vlgmr.msra.gmra.mxu0 %v2218_v33 }
 0x387   : > { %3002 = vmatprep.mubr.msk.f32.mxu0 %vm2481_vm14, %v2221_v62 }
 0x38a   : > { %2606 = vmatmul.mubr.f32.gmra.mxu0 %v2220_v6 }
 0x38b   : > { %3003 = vmatprep.mubr.msk.f32.mxu0 %vm2481_vm14, %v2223_v51 }
 0x38e   : > { %2611 = vmatmul.mubr.f32.gmra.mxu0 %v2222_v17 }
 0x38f   : > { %3004 = vmatprep.mubr.msk.f32.mxu0 %vm2481_vm14, %v2225_v10 }
 0x392   : > { %2616 = vmatmul.mubr.f32.gmra.mxu0 %v2224_v21 }
 0x393   : > { %3005 = vmatprep.mubr.msk.f32.mxu0 %vm2481_vm14, %v2227_v60 }
 0x396   : > { %2621 = vmatmul.mubr.f32.gmra.mxu0 %v2226_v52 }
 0x397   : > { %3006 = vmatprep.mubr.msk.f32.mxu0 %vm2481_vm14, %v2229_v16 }
 0x39a   : > { %2626 = vmatmul.mubr.f32.gmra.mxu0 %v2228_v39 }
 0x39b   : > { %3007 = vmatprep.mubr.msk.f32.mxu0 %vm2481_vm14, %v2231_v40 }
 0x39e   : > { %2631 = vmatmul.mubr.f32.gmra.mxu0 %v2230_v56 }
 0x39f   : > { %3008 = vmatprep.mubr.msk.f32.mxu0 %vm2481_vm14, %v2233_v0 }
 0x3a2   : > { %2636 = vmatmul.mubr.f32.gmra.mxu0 %v2232_v49 }
 0x3a3   : > { %3009 = vmatprep.mubr.msk.f32.mxu0 %vm2481_vm14, %v2235_v20 }
 0x3a6   : > { %2641 = vmatmul.mubr.f32.gmra.mxu0 %v2234_v5 }
 0x3a7   : > { %3010 = vmatprep.mubr.msk.f32.mxu0 %vm2481_vm14, %v2237_v31 }
 0x3aa   : > { %2646 = vmatmul.mubr.f32.gmra.mxu0 %v2236_v19 }
 0x3ab   : > { %3011 = vmatprep.mubr.msk.f32.mxu0 %vm2481_vm14, %v2239_v13 }
 0x3ae   : > { %2651 = vmatmul.mubr.f32.gmra.mxu0 %v2238_v45 }
 0x3af   : > { %3012 = vmatprep.mubr.msk.f32.mxu0 %vm2481_vm14, %v2241_v24 }
 0x3b2   : > { %2656 = vmatmul.mubr.f32.gmra.mxu0 %v2240_v25 }
 0x3b3   : > { %3013 = vmatprep.mubr.msk.f32.mxu0 %vm2481_vm14, %v2243_v26 }
 0x3b6   : > { %2661 = vmatmul.mubr.f32.gmra.mxu0 %v2242_v58 }
 0x3b7   : > { %3014 = vmatprep.mubr.msk.f32.mxu0 %vm2481_vm14, %v2245_v8 }
 0x3ba   : > { %2666 = vmatmul.mubr.f32.gmra.mxu0 %v2244_v7 }
 0x3bb   : > { %3015 = vmatprep.mubr.msk.f32.mxu0 %vm2481_vm14, %v2247_v50 }
 0x3bc   : > { %v3432_v43 = vpop.f32.mrf.mxu1 }
 0x3be   : > { %2671 = vmatmul.mubr.f32.gmra.mxu0 %v2246_v30  ;;  %v2392_v9 = vpop.f32.mrf.mxu1 }
 0x3bf   : > { %3016 = vmatprep.mubr.msk.f32.mxu0 %vm2481_vm14, %v2249_v59 }
 0x3c0   : > { %v3435_v54 = vpop.f32.mrf.mxu1 }
 0x3c2   : > { %2676 = vmatmul.mubr.f32.gmra.mxu0 %v2248_v27  ;;  %v2402_v48 = vpop.f32.mrf.mxu1 }
 0x3c3   : > { %3017 = vmatprep.mubr.msk.f32.mxu0 %vm2481_vm14, %v2251_v35 }
 0x3c4   : > { %v3438_v32 = vpop.f32.mrf.mxu1 }
 0x3c6   : > { %2681 = vmatmul.mubr.f32.gmra.mxu0 %v2250_v38  ;;  %v2412_v61 = vpop.f32.mrf.mxu1 }
 0x3c7   : > { %3018 = vmatprep.mubr.msk.f32.mxu0 %vm2481_vm14, %v2253_v29  ;;  %vm5164_vm14 = vmmov %vm5160_vm0 }
 0x3c8   : > { %v3441_v44 = vpop.f32.mrf.mxu1 }
 0x3ca   : > { %2686 = vmatmul.mubr.f32.gmra.mxu0 %v2252_v42  ;;  %v2422_v34 = vpop.f32.mrf.mxu1 }
 0x3cc   : > { %v3444_v51 = vpop.f32.mrf.mxu1 }
 0x3ce   : > { %v2432_v52 = vpop.f32.mrf.mxu1 }
 0x3d0   : > { %v3447_v0 = vpop.f32.mrf.mxu1 }
 0x3d2   : > { %v2442_v19 = vpop.f32.mrf.mxu1 }
 0x3d4   : > { %v3450_v26 = vpop.f32.mrf.mxu1 }
 0x3d6   : > { %v2452_v30 = vpop.f32.mrf.mxu1 }
 0x3d8   : > { %v3453_v29 = vpop.f32.mrf.mxu1 }
 0x446   : > { %v2602_v28 = vpop.f32.mrf.mxu0 }
 0x447   : > { %v2603_v2 = vadd.f32 %v2602_v28, %v2392_v9 }
 0x448   : > { %v2604_v4 = vpop.f32.mrf.mxu0 }
 0x449   : > { %3582 = vtanh.f32 %v2603_v2  ;;  %v2462_v2 = vpop.f32.mrf.mxu1 }
 0x44a   : > { %v2607_v36 = vpop.f32.mrf.mxu0 }
 0x44b   : > { %v2608_v63 = vadd.f32 %v3432_v43, %v2607_v36 }
 0x44c   : > { %v2609_v3 = vpop.f32.mrf.mxu0 }
 0x44d   : > { %3584 = vtanh.f32 %v2608_v63  ;;  %v3456_v3 = vpop.f32.mrf.mxu1 }
 0x44e   : > { %v2612_v1 = vpop.f32.mrf.mxu0 }
 0x44f   : > { %v2613_v12 = vadd.f32 %v2612_v1, %v2402_v48 }
 0x450   : > { %v2614_v15 = vpop.f32.mrf.mxu0 }
 0x451   : > { %3586 = vtanh.f32 %v2613_v12 }
 0x452   : > { %v2617_v41 = vpop.f32.mrf.mxu0 }
 0x453   : > { %v2618_v55 = vadd.f32 %v3435_v54, %v2617_v41 }
 0x454   : > { %v2619_v23 = vpop.f32.mrf.mxu0 }
 0x455   : > { %3588 = vtanh.f32 %v2618_v55 }
 0x456   : > { %v3583_v37 = vpop.eup %3582  ;;  %v2622_v18 = vpop.f32.mrf.mxu0 }
 0x457   : > { %2709 = vst.msk [vmem:[%s5022_s20] sm:$0xff] %vm5150_vm2, %v3583_v37  ;;  %v2623_v11 = vadd.f32 %v2622_v18, %v2412_v61  ;;  %vm5166_vm2 = vmmov %vm5160_vm0 }
 0x458   : > { %v2624_v46 = vpop.f32.mrf.mxu0 }
 0x459   : > { %3590 = vtanh.f32 %v2623_v11 }
 0x45a   : > { %v3585_v53 = vpop.eup %3584  ;;  %v2627_v57 = vpop.f32.mrf.mxu0 }
 0x45b   : > { %2710 = vst.msk [vmem:[%s5022_s20 + $0x8] sm:$0xff] %vm5151_vm4, %v3585_v53  ;;  %v2628_v14 = vadd.f32 %v3438_v32, %v2627_v57  ;;  %v2472_v32 = vpop.f32.mrf.mxu1  ;;  %vm5167_vm4 = vmmov %vm5160_vm0 }
 0x45c   : > { %v2629_v47 = vpop.f32.mrf.mxu0 }
 0x45d   : > { %3592 = vtanh.f32 %v2628_v14 }
 0x45e   : > { %v3587_v22 = vpop.eup %3586  ;;  %v2632_v33 = vpop.f32.mrf.mxu0 }
 0x45f   : > { %2711 = vst.msk [vmem:[%s5022_s20 + $0x10] sm:$0xff] %vm5152_vm1, %v3587_v22  ;;  %v2633_v62 = vadd.f32 %v2632_v33, %v2422_v34 }
 0x460   : > { %v2634_v6 = vpop.f32.mrf.mxu0 }
 0x461   : > { %3594 = vtanh.f32 %v2633_v62 }
 0x462   : > { %v3589_v17 = vpop.eup %3588  ;;  %v2637_v10 = vpop.f32.mrf.mxu0 }
 0x463   : > { %2712 = vst.msk [vmem:[%s5022_s20 + $0x18] sm:$0xff] %vm5153_vm9, %v3589_v17  ;;  %v2638_v21 = vadd.f32 %v3441_v44, %v2637_v10 }
 0x464   : > { %v2639_v60 = vpop.f32.mrf.mxu0 }
 0x465   : > { %3596 = vtanh.f32 %v2638_v21 }
 0x466   : > { %v3591_v16 = vpop.eup %3590  ;;  %v2642_v39 = vpop.f32.mrf.mxu0 }
 0x467   : > { %2713 = vst.msk [vmem:[%s5022_s20 + $0x20] sm:$0xff] %vm5154_vm5, %v3591_v16  ;;  %v2643_v40 = vadd.f32 %v2642_v39, %v2432_v52 }
 0x468   : > { %v2644_v56 = vpop.f32.mrf.mxu0 }
 0x469   : > { %3598 = vtanh.f32 %v2643_v40 }
 0x46a   : > { %v3593_v49 = vpop.eup %3592  ;;  %v2647_v20 = vpop.f32.mrf.mxu0 }
 0x46b   : > { %2714 = vst.msk [vmem:[%s5022_s20 + $0x28] sm:$0xff] %vm5155_vm3, %v3593_v49  ;;  %v2648_v5 = vadd.f32 %v3444_v51, %v2647_v20 }
 0x46c   : > { %v2649_v31 = vpop.f32.mrf.mxu0 }
 0x46d   : > { %3600 = vtanh.f32 %v2648_v5 }
 0x46e   : > { %v3595_v13 = vpop.eup %3594  ;;  %v2652_v45 = vpop.f32.mrf.mxu0 }
 0x46f   : > { %2715 = vst.msk [vmem:[%s5022_s20 + $0x30] sm:$0xff] %vm5156_vm15, %v3595_v13  ;;  %v2653_v24 = vadd.f32 %v2652_v45, %v2442_v19 }
 0x470   : > { %v2654_v25 = vpop.f32.mrf.mxu0 }
 0x471   : > { %3602 = vtanh.f32 %v2653_v24 }
 0x472   : > { %v3597_v58 = vpop.eup %3596  ;;  %v2657_v8 = vpop.f32.mrf.mxu0 }
 0x473   : > { %2716 = vst.msk [vmem:[%s5022_s20 + $0x38] sm:$0xff] %vm5157_vm10, %v3597_v58  ;;  %v2658_v7 = vadd.f32 %v3447_v0, %v2657_v8 }
 0x474   : > { %v2659_v50 = vpop.f32.mrf.mxu0 }
 0x475   : > { %3604 = vtanh.f32 %v2658_v7 }
 0x476   : > { %v3599_v59 = vpop.eup %3598  ;;  %v2662_v27 = vpop.f32.mrf.mxu0 }
 0x477   : > { %2717 = vst.msk [vmem:[%s5022_s20 + $0x40] sm:$0xff] %vm5158_vm12, %v3599_v59  ;;  %v2663_v35 = vadd.f32 %v2662_v27, %v2452_v30 }
 0x478   : > { %v2664_v38 = vpop.f32.mrf.mxu0 }
 0x479   : > { %3606 = vtanh.f32 %v2663_v35 }
 0x47a   : > { %v3601_v42 = vpop.eup %3600  ;;  %v2667_v43 = vpop.f32.mrf.mxu0 }
 0x47b   : > { %2718 = vst.msk [vmem:[%s5022_s20 + $0x48] sm:$0xff] %vm5159_vm13, %v3601_v42  ;;  %v2668_v9 = vadd.f32 %v3450_v26, %v2667_v43 }
 0x47c   : > { %v2669_v28 = vpop.f32.mrf.mxu0 }
 0x47d   : > { %3608 = vtanh.f32 %v2668_v9 }
 0x47e   : > { %v3603_v4 = vpop.eup %3602  ;;  %v2672_v54 = vpop.f32.mrf.mxu0 }
 0x47f   : > { %2719 = vst.msk [vmem:[%s5022_s20 + $0x50] sm:$0xff] %vm5160_vm0, %v3603_v4  ;;  %v2673_v36 = vadd.f32 %v2672_v54, %v2462_v2 }
 0x480   : > { %v2674_v63 = vpop.f32.mrf.mxu0 }
 0x481   : > { %3610 = vtanh.f32 %v2673_v36 }
 0x482   : > { %v3605_v48 = vpop.eup %3604  ;;  %v2677_v1 = vpop.f32.mrf.mxu0 }
 0x483   : > { %2720 = vst.msk [vmem:[%s5022_s20 + $0x58] sm:$0xff] %vm5161_vm11, %v3605_v48  ;;  %v2678_v12 = vadd.f32 %v3453_v29, %v2677_v1 }
 0x484   : > { %v2679_v15 = vpop.f32.mrf.mxu0 }
 0x485   : > { %3612 = vtanh.f32 %v2678_v12 }
 0x486   : > { %v3607_v41 = vpop.eup %3606  ;;  %v2682_v55 = vpop.f32.mrf.mxu0 }
 0x487   : > { %2721 = vst.msk [vmem:[%s5022_s20 + $0x60] sm:$0xff] %vm5162_vm6, %v3607_v41  ;;  %v2683_v23 = vadd.f32 %v2682_v55, %v2472_v32 }
 0x488   : > { %v2684_v61 = vpop.f32.mrf.mxu0 }
 0x489   : > { %3614 = vtanh.f32 %v2683_v23 }
 0x48a   : > { %v3609_v37 = vpop.eup %3608  ;;  %v2687_v18 = vpop.f32.mrf.mxu0 }
 0x48b   : > { %2722 = vst.msk [vmem:[%s5022_s20 + $0x68] sm:$0xff] %vm5163_vm7, %v3609_v37  ;;  %v2688_v11 = vadd.f32 %v3456_v3, %v2687_v18 }
 0x48c   : > { %v2689_v46 = vpop.f32.mrf.mxu0 }
 0x48d   : > { %3616 = vtanh.f32 %v2688_v11 }
 0x48e   : > { %v3611_v44 = vpop.eup %3610 }
 0x48f   : > { %2723 = vst.msk [vmem:[%s5022_s20 + $0x70] sm:$0xff] %vm5164_vm14, %v3611_v44 }
 0x492   : > { %v3613_v53 = vpop.eup %3612 }
 0x493   : > { %2724 = vst.msk [vmem:[%s5022_s20 + $0x78] sm:$0xff] %vm5165_vm8, %v3613_v53 }
 0x496   : > { %v3615_v57 = vpop.eup %3614 }
 0x497   : > { %2725 = vst.msk [vmem:[%s5022_s20 + $0x80] sm:$0xff] %vm5166_vm2, %v3615_v57 }
 0x49a   : > { %v3617_v14 = vpop.eup %3616 }
 0x49b   : > { %2726 = vst.msk [vmem:[%s5022_s20 + $0x88] sm:$0xff] %vm5167_vm4, %v3617_v14 }
 0x49c PF: > { %s22_s13 = sadd.s32 1, %s3654_s13  }
 0x49d   : > { %p19_p2 = scmp.ge.s32.totalorder %s22_s13, 4  }
 0x49f   :  { %21 = sbr.rel (!%p19_p2) target bundleno = 1 (0x1), region = 112 }
 0x4a4   :  { %2766 = vsyncpa [#allocation3], 1 }
 0x4a5   :  { %2768 = vsyncpa [#allocation3 + $0x1], 1 }

</bundles_post_ra>
